<compile_context>
chip_gen: v5e
topology: v5e:2x2
jax: 0.10.0
libtpu: 0.0.40
codegen_flags: <defaults>
</compile_context>

<pallas_src>
import functools

import jax
import jax.numpy as jnp
import numpy as np
from jax.experimental import pallas as pl
from jax.experimental.pallas import tpu as pltpu

HIDDEN_SIZE = 100
INPUT_SIZE = 4 * 4 * 32   # 512
NUM_CLASSES = 2

HIDDEN_PAD = 128          # H padded to lane width
OUT_PAD = 128             # FC output padded to lane width


def lstm_kernel(x_ref, wih_ref, whh_ref, b_ref, fcw_ref, fcb_ref, out_ref,
                pre_sc, h_sc, c_sc, *, seq_len, chunk_t, batch_p, hidden_p):
    Bp = batch_p
    Hp = hidden_p
    chunk = pl.program_id(0)
    n_chunks = pl.num_programs(0)

    # Init persistent h/c carry on the first chunk.
    @pl.when(chunk == 0)
    def _():
        h_sc[...] = jnp.zeros_like(h_sc)
        c_sc[...] = jnp.zeros_like(c_sc)

    # Hoisted input projection for this chunk:
    # (chunk_t*Bp, D)bf16 @ (D, 4Hp)bf16 -> f32 accumulate, + bias.
    pre_sc[...] = (jnp.dot(x_ref[...], wih_ref[...],
                           preferred_element_type=jnp.float32)
                   + b_ref[...])

    chunk_start = chunk * chunk_t

    def step(t, carry):
        h_prev, c_prev = carry
        row = pl.multiple_of(t * Bp, Bp)
        pre_t = pre_sc[pl.ds(row, Bp), :]                      # (Bp, 4*Hp) f32
        gates = pre_t + jnp.dot(h_prev.astype(jnp.bfloat16), whh_ref[...],
                                preferred_element_type=jnp.float32)
        # packed gate order (i, f, o, g); sigmoid via tanh identity (1 EUP op).
        sig = 0.5 * (1.0 + jnp.tanh(0.5 * gates[:, :3 * Hp]))
        i_g = sig[:, 0 * Hp:1 * Hp]
        f_g = sig[:, 1 * Hp:2 * Hp]
        o_g = sig[:, 2 * Hp:3 * Hp]
        g_g = jnp.tanh(gates[:, 3 * Hp:])
        c_new = f_g * c_prev + i_g * g_g
        h_new = o_g * jnp.tanh(c_new)
        # Mask out timesteps past the true sequence length (zero-padded tail).
        valid = (chunk_start + t) < seq_len
        h_new = jnp.where(valid, h_new, h_prev)
        c_new = jnp.where(valid, c_new, c_prev)
        return (h_new, c_new)

    h0 = h_sc[...]
    c0 = c_sc[...]
    h_last, c_last = jax.lax.fori_loop(0, chunk_t, step, (h0, c0),
                                       unroll=min(chunk_t, 8))
    h_sc[...] = h_last
    c_sc[...] = c_last

    # Final FC on the last hidden state (lane-dense padded output), last chunk only.
    @pl.when(chunk == n_chunks - 1)
    def _():
        out_ref[...] = (jnp.dot(h_last.astype(jnp.bfloat16), fcw_ref[...],
                                preferred_element_type=jnp.float32)
                        + fcb_ref[...]).astype(out_ref.dtype)


def lstm_forward(x, params, chunk_t=None):
    """x: (B, T, INPUT_SIZE) float32, batch_first (PyTorch convention)."""
    w_ih, w_hh, b_ih, b_hh, fc_w, fc_b = params
    B, T, D = x.shape
    H = HIDDEN_SIZE
    Hp = HIDDEN_PAD
    Cp = OUT_PAD
    G = 4 * Hp
    Bp = max(8, ((B + 7) // 8) * 8)

    if chunk_t is None:
        chunk_t = min(T, 256)
    n_chunks = -(-T // chunk_t)
    T_pad = n_chunks * chunk_t

    # PyTorch gate row order is (i, f, g, o); repack as (i, f, o, g).
    perm = jnp.array([0, 1, 3, 2])

    def pack(w, k_in, k_in_p):
        # w: (4H, k_in) -> (k_in_p, 4*Hp) with zero padding, bf16 for the MXU.
        w4 = w.reshape(4, H, k_in)[perm]                                  # (4, H, k_in)
        w4 = jnp.pad(w4, ((0, 0), (0, Hp - H), (0, k_in_p - k_in)))       # (4, Hp, k_in_p)
        return jnp.transpose(w4, (2, 0, 1)).reshape(k_in_p, G)            # (k_in_p, 4*Hp)

    wih_p = pack(w_ih, D, D).astype(jnp.bfloat16)                         # (D, 4*Hp)
    whh_p = pack(w_hh, H, Hp).astype(jnp.bfloat16)                        # (Hp, 4*Hp)

    b4 = (b_ih + b_hh).reshape(4, H)[perm]
    b_p = jnp.pad(b4, ((0, 0), (0, Hp - H))).reshape(1, G)                # (1, 4*Hp) f32

    fcw_p = jnp.pad(fc_w.T, ((0, Hp - H), (0, Cp - NUM_CLASSES))).astype(jnp.bfloat16)
    fcb_p = jnp.pad(fc_b, (0, Cp - NUM_CLASSES)).reshape(1, Cp)           # (1, Cp) f32

    # time-major, batch padded to Bp, time padded to a multiple of chunk_t,
    # flattened to (T_pad*Bp, D) so each grid step DMAs one lane-dense chunk.
    x_tm = jnp.transpose(x, (1, 0, 2))                                    # (T, B, D)
    x_p = jnp.pad(x_tm, ((0, T_pad - T), (0, Bp - B), (0, 0)))            # (T_pad, Bp, D)
    x_flat = x_p.reshape(T_pad * Bp, D).astype(jnp.bfloat16)

    out = pl.pallas_call(
        functools.partial(lstm_kernel, seq_len=T, chunk_t=chunk_t,
                          batch_p=Bp, hidden_p=Hp),
        out_shape=jax.ShapeDtypeStruct((Bp, Cp), jnp.float32),
        grid_spec=pltpu.PrefetchScalarGridSpec(
            num_scalar_prefetch=0,
            grid=(n_chunks,),
            in_specs=[
                pl.BlockSpec((chunk_t * Bp, D), lambda i: (i, 0)),   # x chunk (time-major)
                pl.BlockSpec((D, G), lambda i: (0, 0)),              # W_ih packed (resident)
                pl.BlockSpec((Hp, G), lambda i: (0, 0)),             # W_hh packed (resident)
                pl.BlockSpec((1, G), lambda i: (0, 0)),              # combined bias
                pl.BlockSpec((Hp, Cp), lambda i: (0, 0)),            # fc weight^T (padded)
                pl.BlockSpec((1, Cp), lambda i: (0, 0)),             # fc bias (padded)
            ],
            out_specs=pl.BlockSpec((Bp, Cp), lambda i: (0, 0)),
            scratch_shapes=[
                pltpu.VMEM((chunk_t * Bp, G), jnp.float32),          # per-chunk gate pre-acts
                pltpu.VMEM((Bp, Hp), jnp.float32),                   # h carry (persistent)
                pltpu.VMEM((Bp, Hp), jnp.float32),                   # c carry (persistent)
            ],
        ),
        compiler_params=pltpu.CompilerParams(
            dimension_semantics=("arbitrary",)),
    )(x_flat, wih_p, whh_p, b_p, fcw_p, fcb_p)

    return out[:B, :NUM_CLASSES]


def reference_forward(x, params):
    """Pure-JAX f32 reference matching PyTorch nn.LSTM + Linear semantics."""
    w_ih, w_hh, b_ih, b_hh, fc_w, fc_b = params
    B, T, D = x.shape
    H = HIDDEN_SIZE

    def step(carry, x_t):
        h, c = carry
        gates = x_t @ w_ih.T + b_ih + h @ w_hh.T + b_hh
        i, f, g, o = jnp.split(gates, 4, axis=-1)
        i, f, o = jax.nn.sigmoid(i), jax.nn.sigmoid(f), jax.nn.sigmoid(o)
        g = jnp.tanh(g)
        c = f * c + i * g
        h = o * jnp.tanh(c)
        return (h, c), h

    h0 = jnp.zeros((B, H), jnp.float32)
    c0 = jnp.zeros((B, H), jnp.float32)
    (h_last, _), _ = jax.lax.scan(step, (h0, c0), jnp.transpose(x, (1, 0, 2)))
    return h_last @ fc_w.T + fc_b


def init_params(key):
    """Deterministic init mimicking PyTorch default U(-1/sqrt(H), 1/sqrt(H))."""
    H, D, C = HIDDEN_SIZE, INPUT_SIZE, NUM_CLASSES
    k = 1.0 / np.sqrt(H)
    keys = jax.random.split(key, 6)
    w_ih = jax.random.uniform(keys[0], (4 * H, D), jnp.float32, -k, k)
    w_hh = jax.random.uniform(keys[1], (4 * H, H), jnp.float32, -k, k)
    b_ih = jax.random.uniform(keys[2], (4 * H,), jnp.float32, -k, k)
    b_hh = jax.random.uniform(keys[3], (4 * H,), jnp.float32, -k, k)
    fc_w = jax.random.uniform(keys[4], (C, H), jnp.float32, -k, k)
    fc_b = jax.random.uniform(keys[5], (C,), jnp.float32, -k, k)
    return (w_ih, w_hh, b_ih, b_hh, fc_w, fc_b)


if __name__ == "__main__":
    key = jax.random.PRNGKey(0)
    k_param, k_x = jax.random.split(key)

    B, T = 2, 8
    params = init_params(k_param)
    x = jax.random.normal(k_x, (B, T, INPUT_SIZE), jnp.float32)

    # chunk_t=4 exercises the multi-chunk (persistent h/c carry) path at T=8.
    out = jax.block_until_ready(lstm_forward(x, params, chunk_t=4))
    ref = jax.block_until_ready(reference_forward(x, params))

    assert out.shape == (B, NUM_CLASSES)
    # Tolerance loosened vs. the all-f32 version because matmul operands are bf16
    # (f32 accumulation / state); observed error is ~1e-2 absolute worst case.
    np.testing.assert_allclose(np.asarray(out), np.asarray(ref),
                               rtol=2e-2, atol=2e-2)
    print("KERNEL_OK")
</pallas_src>

<mosaic_0001>
module attributes {stable_mosaic.version = 11 : i64} {
  func.func @lstm_kernel(%arg0: i32, %arg1: memref<32x512xbf16, #tpu.memory_space<vmem>>, %arg2: memref<512x512xbf16, #tpu.memory_space<vmem>>, %arg3: memref<128x512xbf16, #tpu.memory_space<vmem>>, %arg4: memref<1x512xf32, #tpu.memory_space<vmem>>, %arg5: memref<128x128xbf16, #tpu.memory_space<vmem>>, %arg6: memref<1x128xf32, #tpu.memory_space<vmem>>, %arg7: memref<8x128xf32, #tpu.memory_space<vmem>>, %arg8: memref<32x512xf32, #tpu.memory_space<vmem>>, %arg9: memref<8x128xf32, #tpu.memory_space<vmem>>, %arg10: memref<8x128xf32, #tpu.memory_space<vmem>>) attributes {dimension_semantics = [#tpu.dimension_semantics<arbitrary>], iteration_bounds = array<i64: 2>, scalar_prefetch = 0 : i64, scratch_operands = 3 : i64, tpu.core_type = #tpu.core_type<tc>, window_params = [{transform_indices = @transform_0, window_bounds = array<i64: 32, 512>}, {pipeline_mode = #tpu.pipeline_mode<synchronous>, transform_indices = @transform_1, window_bounds = array<i64: 512, 512>}, {pipeline_mode = #tpu.pipeline_mode<synchronous>, transform_indices = @transform_2, window_bounds = array<i64: 128, 512>}, {pipeline_mode = #tpu.pipeline_mode<synchronous>, transform_indices = @transform_3, window_bounds = array<i64: 1, 512>}, {pipeline_mode = #tpu.pipeline_mode<synchronous>, transform_indices = @transform_4, window_bounds = array<i64: 128, 128>}, {pipeline_mode = #tpu.pipeline_mode<synchronous>, transform_indices = @transform_5, window_bounds = array<i64: 1, 128>}, {pipeline_mode = #tpu.pipeline_mode<synchronous>, transform_indices = @transform_6, window_bounds = array<i64: 8, 128>}]} {
    %c0_i32 = arith.constant 0 : i32
    %0 = arith.cmpi eq, %arg0, %c0_i32 : i32
    %1 = arith.extui %0 : i1 to i32
    %c0_i32_0 = arith.constant 0 : i32
    %2 = arith.cmpi ne, %1, %c0_i32_0 : i32
    scf.if %2 {
      %cst_55 = arith.constant 0.000000e+00 : f32
      %138 = vector.broadcast %cst_55 : f32 to vector<8x128xf32>
      %c0_56 = arith.constant 0 : index
      %c0_57 = arith.constant 0 : index
      %139 = vector.load %arg9[%c0_56, %c0_57] : memref<8x128xf32, #tpu.memory_space<vmem>>, vector<8x128xf32>
      tpu.vector_store %arg9[%c0_56, %c0_57], %138 {strides = array<i32>} : memref<8x128xf32, #tpu.memory_space<vmem>>, vector<8x128xf32>,
      %cst_58 = arith.constant 0.000000e+00 : f32
      %140 = vector.broadcast %cst_58 : f32 to vector<8x128xf32>
      %c0_59 = arith.constant 0 : index
      %c0_60 = arith.constant 0 : index
      %141 = vector.load %arg10[%c0_59, %c0_60] : memref<8x128xf32, #tpu.memory_space<vmem>>, vector<8x128xf32>
      tpu.vector_store %arg10[%c0_59, %c0_60], %140 {strides = array<i32>} : memref<8x128xf32, #tpu.memory_space<vmem>>, vector<8x128xf32>,
    } else {
    }
    %c0 = arith.constant 0 : index
    %c0_1 = arith.constant 0 : index
    %3 = vector.load %arg1[%c0, %c0_1] : memref<32x512xbf16, #tpu.memory_space<vmem>>, vector<32x512xbf16>
    %c0_2 = arith.constant 0 : index
    %c0_3 = arith.constant 0 : index
    %4 = vector.load %arg2[%c0_2, %c0_3] : memref<512x512xbf16, #tpu.memory_space<vmem>>, vector<512x512xbf16>
    %cst = arith.constant dense<0.000000e+00> : vector<32x512xf32>
    %5 = tpu.matmul %3, %4, %cst {dimension_numbers = #tpu.dot_dimension_numbers<[1], [0], [0], [1], [0, 0, 1, 1], [], []>} : vector<32x512xbf16>, vector<512x512xbf16>, vector<32x512xf32> -> vector<32x512xf32>
    %c0_4 = arith.constant 0 : index
    %c0_5 = arith.constant 0 : index
    %6 = vector.load %arg4[%c0_4, %c0_5] : memref<1x512xf32, #tpu.memory_space<vmem>>, vector<1x512xf32>
    %7 = vector.broadcast %6 : vector<1x512xf32> to vector<32x512xf32>
    %8 = arith.addf %5, %7 : vector<32x512xf32>
    %c0_6 = arith.constant 0 : index
    %c0_7 = arith.constant 0 : index
    %9 = vector.load %arg8[%c0_6, %c0_7] : memref<32x512xf32, #tpu.memory_space<vmem>>, vector<32x512xf32>
    tpu.vector_store %arg8[%c0_6, %c0_7], %8 {strides = array<i32>} : memref<32x512xf32, #tpu.memory_space<vmem>>, vector<32x512xf32>,
    %c4_i32 = arith.constant 4 : i32
    %10 = arith.muli %arg0, %c4_i32 : i32
    %c0_8 = arith.constant 0 : index
    %c0_9 = arith.constant 0 : index
    %11 = vector.load %arg9[%c0_8, %c0_9] : memref<8x128xf32, #tpu.memory_space<vmem>>, vector<8x128xf32>
    %c0_10 = arith.constant 0 : index
    %c0_11 = arith.constant 0 : index
    %12 = vector.load %arg10[%c0_10, %c0_11] : memref<8x128xf32, #tpu.memory_space<vmem>>, vector<8x128xf32>
    %c0_i32_12 = arith.constant 0 : i32
    %c8_i32 = arith.constant 8 : i32
    %13 = arith.muli %c0_i32_12, %c8_i32 : i32
    %14 = tpu.assume_multiple %13, 8 : i32
    %15 = arith.index_cast %14 : i32 to index
    %c0_13 = arith.constant 0 : index
    %16 = vector.load %arg8[%15, %c0_13] : memref<32x512xf32, #tpu.memory_space<vmem>>, vector<8x512xf32>
    %17 = arith.truncf %11 : vector<8x128xf32> to vector<8x128xbf16>
    %c0_14 = arith.constant 0 : index
    %c0_15 = arith.constant 0 : index
    %18 = vector.load %arg3[%c0_14, %c0_15] : memref<128x512xbf16, #tpu.memory_space<vmem>>, vector<128x512xbf16>
    %cst_16 = arith.constant dense<0.000000e+00> : vector<8x512xf32>
    %19 = tpu.matmul %17, %18, %cst_16 {dimension_numbers = #tpu.dot_dimension_numbers<[1], [0], [0], [1], [0, 0, 1, 1], [], []>} : vector<8x128xbf16>, vector<128x512xbf16>, vector<8x512xf32> -> vector<8x512xf32>
    %20 = arith.addf %16, %19 : vector<8x512xf32>
    %21 = vector.extract_strided_slice %20 {offsets = [0, 0], sizes = [8, 384], strides = [1, 1]} : vector<8x512xf32> to vector<8x384xf32>
    %cst_17 = arith.constant 5.000000e-01 : f32
    %22 = vector.broadcast %cst_17 : f32 to vector<8x384xf32>
    %23 = arith.mulf %22, %21 : vector<8x384xf32>
    %24 = math.tanh %23 : vector<8x384xf32>
    %cst_18 = arith.constant 1.000000e+00 : f32
    %25 = vector.broadcast %cst_18 : f32 to vector<8x384xf32>
    %26 = arith.addf %25, %24 : vector<8x384xf32>
    %cst_19 = arith.constant 5.000000e-01 : f32
    %27 = vector.broadcast %cst_19 : f32 to vector<8x384xf32>
    %28 = arith.mulf %27, %26 : vector<8x384xf32>
    %29 = vector.extract_strided_slice %28 {offsets = [0, 0], sizes = [8, 128], strides = [1, 1]} : vector<8x384xf32> to vector<8x128xf32>
    %30 = vector.extract_strided_slice %28 {offsets = [0, 128], sizes = [8, 128], strides = [1, 1]} : vector<8x384xf32> to vector<8x128xf32>
    %31 = vector.extract_strided_slice %28 {offsets = [0, 256], sizes = [8, 128], strides = [1, 1]} : vector<8x384xf32> to vector<8x128xf32>
    %32 = vector.extract_strided_slice %20 {offsets = [0, 384], sizes = [8, 128], strides = [1, 1]} : vector<8x512xf32> to vector<8x128xf32>
    %33 = math.tanh %32 : vector<8x128xf32>
    %34 = arith.mulf %30, %12 : vector<8x128xf32>
    %35 = arith.mulf %29, %33 : vector<8x128xf32>
    %36 = arith.addf %34, %35 : vector<8x128xf32>
    %37 = math.tanh %36 : vector<8x128xf32>
    %38 = arith.mulf %31, %37 : vector<8x128xf32>
    %39 = arith.addi %10, %c0_i32_12 : i32
    %c8_i32_20 = arith.constant 8 : i32
    %40 = arith.cmpi slt, %39, %c8_i32_20 : i32
    %41 = arith.select %40, %38, %11 : vector<8x128xf32>
    %42 = arith.select %40, %36, %12 : vector<8x128xf32>
    %c1_i32 = arith.constant 1 : i32
    %c8_i32_21 = arith.constant 8 : i32
    %43 = arith.muli %c1_i32, %c8_i32_21 : i32
    %44 = tpu.assume_multiple %43, 8 : i32
    %45 = arith.index_cast %44 : i32 to index
    %c0_22 = arith.constant 0 : index
    %46 = vector.load %arg8[%45, %c0_22] : memref<32x512xf32, #tpu.memory_space<vmem>>, vector<8x512xf32>
    %47 = arith.truncf %41 : vector<8x128xf32> to vector<8x128xbf16>
    %c0_23 = arith.constant 0 : index
    %c0_24 = arith.constant 0 : index
    %48 = vector.load %arg3[%c0_23, %c0_24] : memref<128x512xbf16, #tpu.memory_space<vmem>>, vector<128x512xbf16>
    %cst_25 = arith.constant dense<0.000000e+00> : vector<8x512xf32>
    %49 = tpu.matmul %47, %48, %cst_25 {dimension_numbers = #tpu.dot_dimension_numbers<[1], [0], [0], [1], [0, 0, 1, 1], [], []>} : vector<8x128xbf16>, vector<128x512xbf16>, vector<8x512xf32> -> vector<8x512xf32>
    %50 = arith.addf %46, %49 : vector<8x512xf32>
    %51 = vector.extract_strided_slice %50 {offsets = [0, 0], sizes = [8, 384], strides = [1, 1]} : vector<8x512xf32> to vector<8x384xf32>
    %cst_26 = arith.constant 5.000000e-01 : f32
    %52 = vector.broadcast %cst_26 : f32 to vector<8x384xf32>
    %53 = arith.mulf %52, %51 : vector<8x384xf32>
    %54 = math.tanh %53 : vector<8x384xf32>
    %cst_27 = arith.constant 1.000000e+00 : f32
    %55 = vector.broadcast %cst_27 : f32 to vector<8x384xf32>
    %56 = arith.addf %55, %54 : vector<8x384xf32>
    %cst_28 = arith.constant 5.000000e-01 : f32
    %57 = vector.broadcast %cst_28 : f32 to vector<8x384xf32>
    %58 = arith.mulf %57, %56 : vector<8x384xf32>
    %59 = vector.extract_strided_slice %58 {offsets = [0, 0], sizes = [8, 128], strides = [1, 1]} : vector<8x384xf32> to vector<8x128xf32>
    %60 = vector.extract_strided_slice %58 {offsets = [0, 128], sizes = [8, 128], strides = [1, 1]} : vector<8x384xf32> to vector<8x128xf32>
    %61 = vector.extract_strided_slice %58 {offsets = [0, 256], sizes = [8, 128], strides = [1, 1]} : vector<8x384xf32> to vector<8x128xf32>
    %62 = vector.extract_strided_slice %50 {offsets = [0, 384], sizes = [8, 128], strides = [1, 1]} : vector<8x512xf32> to vector<8x128xf32>
    %63 = math.tanh %62 : vector<8x128xf32>
    %64 = arith.mulf %60, %42 : vector<8x128xf32>
    %65 = arith.mulf %59, %63 : vector<8x128xf32>
    %66 = arith.addf %64, %65 : vector<8x128xf32>
    %67 = math.tanh %66 : vector<8x128xf32>
    %68 = arith.mulf %61, %67 : vector<8x128xf32>
    %69 = arith.addi %10, %c1_i32 : i32
    %c8_i32_29 = arith.constant 8 : i32
    %70 = arith.cmpi slt, %69, %c8_i32_29 : i32
    %71 = arith.select %70, %68, %41 : vector<8x128xf32>
    %72 = arith.select %70, %66, %42 : vector<8x128xf32>
    %c2_i32 = arith.constant 2 : i32
    %c8_i32_30 = arith.constant 8 : i32
    %73 = arith.muli %c2_i32, %c8_i32_30 : i32
    %74 = tpu.assume_multiple %73, 8 : i32
    %75 = arith.index_cast %74 : i32 to index
    %c0_31 = arith.constant 0 : index
    %76 = vector.load %arg8[%75, %c0_31] : memref<32x512xf32, #tpu.memory_space<vmem>>, vector<8x512xf32>
    %77 = arith.truncf %71 : vector<8x128xf32> to vector<8x128xbf16>
    %c0_32 = arith.constant 0 : index
    %c0_33 = arith.constant 0 : index
    %78 = vector.load %arg3[%c0_32, %c0_33] : memref<128x512xbf16, #tpu.memory_space<vmem>>, vector<128x512xbf16>
    %cst_34 = arith.constant dense<0.000000e+00> : vector<8x512xf32>
    %79 = tpu.matmul %77, %78, %cst_34 {dimension_numbers = #tpu.dot_dimension_numbers<[1], [0], [0], [1], [0, 0, 1, 1], [], []>} : vector<8x128xbf16>, vector<128x512xbf16>, vector<8x512xf32> -> vector<8x512xf32>
    %80 = arith.addf %76, %79 : vector<8x512xf32>
    %81 = vector.extract_strided_slice %80 {offsets = [0, 0], sizes = [8, 384], strides = [1, 1]} : vector<8x512xf32> to vector<8x384xf32>
    %cst_35 = arith.constant 5.000000e-01 : f32
    %82 = vector.broadcast %cst_35 : f32 to vector<8x384xf32>
    %83 = arith.mulf %82, %81 : vector<8x384xf32>
    %84 = math.tanh %83 : vector<8x384xf32>
    %cst_36 = arith.constant 1.000000e+00 : f32
    %85 = vector.broadcast %cst_36 : f32 to vector<8x384xf32>
    %86 = arith.addf %85, %84 : vector<8x384xf32>
    %cst_37 = arith.constant 5.000000e-01 : f32
    %87 = vector.broadcast %cst_37 : f32 to vector<8x384xf32>
    %88 = arith.mulf %87, %86 : vector<8x384xf32>
    %89 = vector.extract_strided_slice %88 {offsets = [0, 0], sizes = [8, 128], strides = [1, 1]} : vector<8x384xf32> to vector<8x128xf32>
    %90 = vector.extract_strided_slice %88 {offsets = [0, 128], sizes = [8, 128], strides = [1, 1]} : vector<8x384xf32> to vector<8x128xf32>
    %91 = vector.extract_strided_slice %88 {offsets = [0, 256], sizes = [8, 128], strides = [1, 1]} : vector<8x384xf32> to vector<8x128xf32>
    %92 = vector.extract_strided_slice %80 {offsets = [0, 384], sizes = [8, 128], strides = [1, 1]} : vector<8x512xf32> to vector<8x128xf32>
    %93 = math.tanh %92 : vector<8x128xf32>
    %94 = arith.mulf %90, %72 : vector<8x128xf32>
    %95 = arith.mulf %89, %93 : vector<8x128xf32>
    %96 = arith.addf %94, %95 : vector<8x128xf32>
    %97 = math.tanh %96 : vector<8x128xf32>
    %98 = arith.mulf %91, %97 : vector<8x128xf32>
    %99 = arith.addi %10, %c2_i32 : i32
    %c8_i32_38 = arith.constant 8 : i32
    %100 = arith.cmpi slt, %99, %c8_i32_38 : i32
    %101 = arith.select %100, %98, %71 : vector<8x128xf32>
    %102 = arith.select %100, %96, %72 : vector<8x128xf32>
    %c3_i32 = arith.constant 3 : i32
    %c8_i32_39 = arith.constant 8 : i32
    %103 = arith.muli %c3_i32, %c8_i32_39 : i32
    %104 = tpu.assume_multiple %103, 8 : i32
    %105 = arith.index_cast %104 : i32 to index
    %c0_40 = arith.constant 0 : index
    %106 = vector.load %arg8[%105, %c0_40] : memref<32x512xf32, #tpu.memory_space<vmem>>, vector<8x512xf32>
    %107 = arith.truncf %101 : vector<8x128xf32> to vector<8x128xbf16>
    %c0_41 = arith.constant 0 : index
    %c0_42 = arith.constant 0 : index
    %108 = vector.load %arg3[%c0_41, %c0_42] : memref<128x512xbf16, #tpu.memory_space<vmem>>, vector<128x512xbf16>
    %cst_43 = arith.constant dense<0.000000e+00> : vector<8x512xf32>
    %109 = tpu.matmul %107, %108, %cst_43 {dimension_numbers = #tpu.dot_dimension_numbers<[1], [0], [0], [1], [0, 0, 1, 1], [], []>} : vector<8x128xbf16>, vector<128x512xbf16>, vector<8x512xf32> -> vector<8x512xf32>
    %110 = arith.addf %106, %109 : vector<8x512xf32>
    %111 = vector.extract_strided_slice %110 {offsets = [0, 0], sizes = [8, 384], strides = [1, 1]} : vector<8x512xf32> to vector<8x384xf32>
    %cst_44 = arith.constant 5.000000e-01 : f32
    %112 = vector.broadcast %cst_44 : f32 to vector<8x384xf32>
    %113 = arith.mulf %112, %111 : vector<8x384xf32>
    %114 = math.tanh %113 : vector<8x384xf32>
    %cst_45 = arith.constant 1.000000e+00 : f32
    %115 = vector.broadcast %cst_45 : f32 to vector<8x384xf32>
    %116 = arith.addf %115, %114 : vector<8x384xf32>
    %cst_46 = arith.constant 5.000000e-01 : f32
    %117 = vector.broadcast %cst_46 : f32 to vector<8x384xf32>
    %118 = arith.mulf %117, %116 : vector<8x384xf32>
    %119 = vector.extract_strided_slice %118 {offsets = [0, 0], sizes = [8, 128], strides = [1, 1]} : vector<8x384xf32> to vector<8x128xf32>
    %120 = vector.extract_strided_slice %118 {offsets = [0, 128], sizes = [8, 128], strides = [1, 1]} : vector<8x384xf32> to vector<8x128xf32>
    %121 = vector.extract_strided_slice %118 {offsets = [0, 256], sizes = [8, 128], strides = [1, 1]} : vector<8x384xf32> to vector<8x128xf32>
    %122 = vector.extract_strided_slice %110 {offsets = [0, 384], sizes = [8, 128], strides = [1, 1]} : vector<8x512xf32> to vector<8x128xf32>
    %123 = math.tanh %122 : vector<8x128xf32>
    %124 = arith.mulf %120, %102 : vector<8x128xf32>
    %125 = arith.mulf %119, %123 : vector<8x128xf32>
    %126 = arith.addf %124, %125 : vector<8x128xf32>
    %127 = math.tanh %126 : vector<8x128xf32>
    %128 = arith.mulf %121, %127 : vector<8x128xf32>
    %129 = arith.addi %10, %c3_i32 : i32
    %c8_i32_47 = arith.constant 8 : i32
    %130 = arith.cmpi slt, %129, %c8_i32_47 : i32
    %131 = arith.select %130, %128, %101 : vector<8x128xf32>
    %132 = arith.select %130, %126, %102 : vector<8x128xf32>
    %c4_i32_48 = arith.constant 4 : i32
    %c0_49 = arith.constant 0 : index
    %c0_50 = arith.constant 0 : index
    %133 = vector.load %arg9[%c0_49, %c0_50] : memref<8x128xf32, #tpu.memory_space<vmem>>, vector<8x128xf32>
    tpu.vector_store %arg9[%c0_49, %c0_50], %131 {strides = array<i32>} : memref<8x128xf32, #tpu.memory_space<vmem>>, vector<8x128xf32>,
    %c0_51 = arith.constant 0 : index
    %c0_52 = arith.constant 0 : index
    %134 = vector.load %arg10[%c0_51, %c0_52] : memref<8x128xf32, #tpu.memory_space<vmem>>, vector<8x128xf32>
    tpu.vector_store %arg10[%c0_51, %c0_52], %132 {strides = array<i32>} : memref<8x128xf32, #tpu.memory_space<vmem>>, vector<8x128xf32>,
    %c1_i32_53 = arith.constant 1 : i32
    %135 = arith.cmpi eq, %arg0, %c1_i32_53 : i32
    %136 = arith.extui %135 : i1 to i32
    %c0_i32_54 = arith.constant 0 : i32
    %137 = arith.cmpi ne, %136, %c0_i32_54 : i32
    scf.if %137 {
      %138 = arith.truncf %131 : vector<8x128xf32> to vector<8x128xbf16>
      %c0_55 = arith.constant 0 : index
      %c0_56 = arith.constant 0 : index
      %139 = vector.load %arg5[%c0_55, %c0_56] : memref<128x128xbf16, #tpu.memory_space<vmem>>, vector<128x128xbf16>
      %cst_57 = arith.constant dense<0.000000e+00> : vector<8x128xf32>
      %140 = tpu.matmul %138, %139, %cst_57 {dimension_numbers = #tpu.dot_dimension_numbers<[1], [0], [0], [1], [0, 0, 1, 1], [], []>} : vector<8x128xbf16>, vector<128x128xbf16>, vector<8x128xf32> -> vector<8x128xf32>
      %c0_58 = arith.constant 0 : index
      %c0_59 = arith.constant 0 : index
      %141 = vector.load %arg6[%c0_58, %c0_59] : memref<1x128xf32, #tpu.memory_space<vmem>>, vector<1x128xf32>
      %142 = vector.broadcast %141 : vector<1x128xf32> to vector<8x128xf32>
      %143 = arith.addf %140, %142 : vector<8x128xf32>
      %c0_60 = arith.constant 0 : index
      %c0_61 = arith.constant 0 : index
      %144 = vector.load %arg7[%c0_60, %c0_61] : memref<8x128xf32, #tpu.memory_space<vmem>>, vector<8x128xf32>
      tpu.vector_store %arg7[%c0_60, %c0_61], %143 {strides = array<i32>} : memref<8x128xf32, #tpu.memory_space<vmem>>, vector<8x128xf32>,
    } else {
    }
    return
  }
  func.func @transform_0(%arg0: i32) -> (i32, i32) {
    %c0_i32 = arith.constant 0 : i32
    %c0_i32_0 = arith.constant 0 : i32
    return %arg0, %c0_i32 : i32, i32
  }
  func.func @transform_1(%arg0: i32) -> (i32, i32) {
    %c0_i32 = arith.constant 0 : i32
    %c0_i32_0 = arith.constant 0 : i32
    %c0_i32_1 = arith.constant 0 : i32
    return %c0_i32, %c0_i32_0 : i32, i32
  }
  func.func @transform_2(%arg0: i32) -> (i32, i32) {
    %c0_i32 = arith.constant 0 : i32
    %c0_i32_0 = arith.constant 0 : i32
    %c0_i32_1 = arith.constant 0 : i32
    return %c0_i32, %c0_i32_0 : i32, i32
  }
  func.func @transform_3(%arg0: i32) -> (i32, i32) {
    %c0_i32 = arith.constant 0 : i32
    %c0_i32_0 = arith.constant 0 : i32
    %c0_i32_1 = arith.constant 0 : i32
    return %c0_i32, %c0_i32_0 : i32, i32
  }
  func.func @transform_4(%arg0: i32) -> (i32, i32) {
    %c0_i32 = arith.constant 0 : i32
    %c0_i32_0 = arith.constant 0 : i32
    %c0_i32_1 = arith.constant 0 : i32
    return %c0_i32, %c0_i32_0 : i32, i32
  }
  func.func @transform_5(%arg0: i32) -> (i32, i32) {
    %c0_i32 = arith.constant 0 : i32
    %c0_i32_0 = arith.constant 0 : i32
    %c0_i32_1 = arith.constant 0 : i32
    return %c0_i32, %c0_i32_0 : i32, i32
  }
  func.func @transform_6(%arg0: i32) -> (i32, i32) {
    %c0_i32 = arith.constant 0 : i32
    %c0_i32_0 = arith.constant 0 : i32
    %c0_i32_1 = arith.constant 0 : i32
    return %c0_i32, %c0_i32_0 : i32, i32
  }
}

</mosaic_0001>

<bundles_post_ra>
// kernel: tpu_custom_call.1
= control target key start
LH: loop header
LB: loop body
LE: loop exit
PB: predicated region body
PF: predicated region fallthrough
CT: control target
= control target key end

     0   :  { %11 = vsyncpa [#allocation6], 0  ;;  %s4018_s0 = inlined_call_operand.hbm [shape: bf16[64,512], index: 0, kind: input, shape index: {}]   ;;  %s4019_s1 = inlined_call_operand.hbm [shape: bf16[512,512], index: 1, kind: input, shape index: {}]   ;;  %s4020_s2 = inlined_call_operand.hbm [shape: bf16[128,512], index: 2, kind: input, shape index: {}]   ;;  %s4021_s3 = inlined_call_operand.hbm [shape: f32[1,512], index: 3, kind: input, shape index: {}]   ;;  %s4022_s4 = inlined_call_operand.hbm [shape: bf16[128,128], index: 4, kind: input, shape index: {}]   ;;  %s4023_s5 = inlined_call_operand.vmem [shape: f32[1,128], index: 5, kind: input, shape index: {}]   ;;  %s4024_s6 = inlined_call_operand.hbm [shape: f32[8,128], index: 6, kind: output, shape index: {}]  }
   0x1   :  { %13 = vsyncpa [#allocation6 + $0x1], 0 }
   0x2   :  { %14 = vsyncpa [#allocation9], 0 }
   0x3   :  { %15 = vsyncpa [#allocation12], 0 }
   0x4   :  { %16 = vsyncpa [#allocation7], 0  ;;  %s3527_s21 = smov 0   ;;  %s3529_s22 = smov 0  }
   0x5   :  { %s3531_s23 = smov 0   ;;  %s3533_s24 = smov 0  }
   0x6 LB: > { %s3546_s25 = sadd.s32 4294967295, %s3480_s24   ;;  %p42_p0 = scmp.ne.s32.totalorder %s3472_s22, %s3468_s21  ;;  %s3480_s24 = sphi %s3533_s24, %s4047_s24   ;;  %s3476_s23 = sphi %s3531_s23, %s4046_s23   ;;  %s3472_s22 = sphi %s3529_s22, %s4045_s22   ;;  %s3468_s21 = sphi %s3527_s21, %s4044_s21  }
   0x7   : > { %p43_p1 = scmp.eq.s32.totalorder %s3546_s25, 0  ;;  %p2218_p2 = scmp.ge.s32.totalorder %s3480_s24, 1 }
   0x8   : > { %p179_p3 = scmp.lt.s32.totalorder %s3480_s24, 3  ;;  %p2219_p4 = scmp.ne.s32.totalorder %s3546_s25, 0 }
   0x9   : > { %p3555_p5 = por %p43_p1, %p42_p0  ;;  %s190_s29 = sshll.u32 %s4019_s1, 4  ;;  %s191_s29 = int_to_ptr.hbm [resolvable:$true] %s190_s29 }
   0xa   : > { %p3562_p6 = pnand %p2218_p2, %p179_p3  ;;  %s3482_s7 = smov [#allocation8]  }
   0xb   : > { %s192_s8 = sshll.u32 %s3482_s7, 4  ;;  %s219_s12 = sshll.u32 %s4021_s3, 4  ;;  %s193_s8 = int_to_ptr.vmem [resolvable:$true] %s192_s8  ;;  %s220_s12 = int_to_ptr.hbm [resolvable:$true] %s219_s12 }
   0xc   : > { %p3145_p7 = pneg %p3562_p6  ;;  %s3483_s13 = smov 256  }
   0xd   : > { %s3484_s14 = smov 16   ;;  %s3485_s15 = smov [#allocation11]  }
   0xe   : > { %p3570_p8 = pnand %p3145_p7, %p43_p1  ;;  %s221_s16 = sshll.u32 %s3485_s15, 4  ;;  %s222_s16 = int_to_ptr.vmem [resolvable:$true] %s221_s16 }
   0xf   : > { %s204_s19 = sshll.u32 %s4020_s2, 4  ;;  %s230_s27 = sshll.u32 %s4022_s4, 4  ;;  %s205_s19 = int_to_ptr.hbm [resolvable:$true] %s204_s19  ;;  %s231_s27 = int_to_ptr.hbm [resolvable:$true] %s230_s27 }
  0x10   : > { %3148 = dma.hbm_to_vmem [thread:$0]  (!%p3570_p8), %s191_s29, 16384, %s193_s8, [#allocation9], %s3483_s13, %s3483_s13, %s3484_s14  }
  0x11   : > { %3154 = dma.hbm_to_vmem [thread:$0]  (!%p3570_p8), %s220_s12, 64, %s222_s16, [#allocation12]  }
  0x12   : > { %s3486_s28 = smov [#allocation10]   ;;  %s3487_s7 = smov [#allocation13]  }
  0x13   : > { %s206_s29 = sshll.u32 %s3486_s28, 4  ;;  %s232_s8 = sshll.u32 %s3487_s7, 4  ;;  %s207_s29 = int_to_ptr.vmem [resolvable:$true] %s206_s29  ;;  %s233_s8 = int_to_ptr.vmem [resolvable:$true] %s232_s8 }
  0x14   : > { %3151 = dma.hbm_to_vmem [thread:$0]  (!%p3570_p8), %s205_s19, 4096, %s207_s29, [#allocation9], %s3483_s13, %s3483_s13, %s3484_s14  }
  0x15   : > { %s3488_s10 = smov 64   ;;  %s3489_s11 = smov 4  }
  0x16   : > { %3157 = dma.hbm_to_vmem [thread:$0]  (!%p3570_p8), %s231_s27, 1024, %s233_s8, [#allocation12], %s3488_s10, %s3488_s10, %s3489_s11  }
  0x17   : > { %s3598_s12 = sadd.s32 1, %s3480_s24   ;;  %s29_s16 = sadd.s32 1, %s3476_s23 }
  0x18   : > { %s26_s15 = ssub.s32 %s3480_s24, %s3598_s12  ;;  %p36_p10 = scmp.ne.s32.totalorder %s3476_s23, %s3472_s22 }
  0x19   : > { %p27_p9 = scmp.eq.s32.totalorder %s26_s15, 0  ;;  %p37_p11 = scmp.eq.s32.totalorder %s3480_s24, 0 }
  0x1a   : > { %s249_s18 = sand.u32 1, %s3476_s23   ;;  %s2946_s19 = sshll.u32 %s3480_s24, 6 }
  0x1b   : > { %s3607_s17 = scalar_select %p27_p9, %s3476_s23, %s29_s16  }
  0x1c   : > { %p38_p12 = por %p37_p11, %p36_p10  ;;  %p3166_p13 = scmp.lt.s32.totalorder %s3480_s24, 2 }
  0x1d   : > { %s2224_s20 = sshll.u32 %s249_s18, 6  ;;  %s259_s9 = scalar_lea.hbm %s4018_s0, %s2946_s19 }
  0x1e   : > { %s260_s27 = sshll.u32 %s259_s9, 4  ;;  %s253_s29 = scalar_lea.vmem [#allocation5], %s2224_s20  ;;  %s261_s27 = int_to_ptr.hbm [resolvable:$true] %s260_s27 }
  0x1f   : > { %s262_s7 = sshll.u32 %s253_s29, 4  ;;  %p3615_p0 = pnand %p3166_p13, %p38_p12  ;;  %s263_s7 = int_to_ptr.vmem [resolvable:$true] %s262_s7 }
  0x20   : > { %s250_s10 = scalar_lea.sflag [#allocation6], %s249_s18  ;;  %s3376_s11 = sshra.s32 %s261_s27, 4  ;;  %s3377_s11 = int_to_ptr.hbm [resolvable:$true] %s3376_s11 }
  0x21   : > { %s3378_s15 = scalar_lea.hbm %s3377_s11, 64  ;;  %p3380_p3 = pneg %p3615_p0 }
  0x22   : > { %p3379_p2 = scmp.ne.s32.totalorder %s3377_s11, %s3378_s15  ;;  %s3383_s19 = scalar_lea.hbm %s4018_s0, 128 }
  0x23   : > { %p3384_p9 = scmp.lt.s32.totalorder %s3377_s11, %s4018_s0  ;;  %p3385_p10 = scmp.lt.s32.totalorder %s3383_s19, %s3378_s15 }
  0x24   : > { %p3381_p7 = pnand %p3380_p3, %p3379_p2 }
  0x25   : > { %p3386_p11 = por %p3385_p10, %p3384_p9 }
  0x26   : > { %p3382_p8 = pneg %p3381_p7 }
  0x28   : > { %p3387_p12 = pnand %p3386_p11, %p3382_p8 }
  0x2a   : > { %3390 = shalt.err (!%p3387_p12)
}
  0x2b   : > { %3161 = dma.hbm_to_vmem [thread:$0]  (!%p3615_p0), %s261_s27, 1024, %s263_s7, %s250_s10, %s3483_s13, %s3483_s13, %s3484_s14  }
  0x2c   : > { %274 = sbr.rel (%p3562_p6) target bundleno = 1031 (0x407), region = 44 }
  0x31   : > { %s276_s18 = sand.u32 1, %s3472_s22  }
  0x32   : > { %s2229_s28 = sshll.u32 %s276_s18, 6  ;;  %s277_s9 = scalar_lea.sflag [#allocation6], %s276_s18 }
  0x33   : > { %s3635_s29 = scalar_lea.vmem [#allocation5], %s2229_s28 }
  0x34   : > { %3451 = dma.done.wait (%p3555_p5), %s277_s9, 1024  }
  0x35   : > { %3453 = vsyncadd (%p3555_p5), %s277_s9, 4294966272 }
  0x36   : > { %3455 = dma.done.wait (%p43_p1), [#allocation9], 20480  }
  0x37   : > { %3457 = vsyncadd (%p43_p1), [#allocation9], 4294946816 }
  0x38   : > { %3459 = dma.done.wait (%p43_p1), [#allocation12], 1088  }
  0x39   : > { %3461 = vsyncadd (%p43_p1), [#allocation12], 4294966208  ;;  %329 = sbr.rel (%p2219_p4) target bundleno = 65 (0x41), region = 68 }
  0x3e   : > { %v3490_v0 = vmov 0.0  }
  0x3f   : > { %330 = vst [vmem:[#allocation3] sm:$0xff] %v3490_v0 }
  0x40   : > { %331 = vst [vmem:[#allocation4] sm:$0xff] %v3490_v0 }
  0x41 PF: > { %v2381_v1 = vld [vmem:[#allocation8 + $0xe0] sm:$0xf]  ;;  %v2985_v2 = vld [vmem:[#allocation8 + $0xec] sm:$0xf0]  ;;  %s3918_s26 = sshll.u32 %s3546_s25, 2  ;;  %p2908_p13 = scmp.ne.s32.totalorder %s3546_s25, 1 }
  0x42   : > { %v2509_v3 = vld [vmem:[#allocation8 + $0x1e0] sm:$0xf]  ;;  %v2382_v4 = vor.u32 %v2985_v2, %v2381_v1  ;;  %v3017_v5 = vld [vmem:[#allocation8 + $0x1ec] sm:$0xf0]  ;;  %p1755_p1 = scmp.lt.s32.totalorder %s3918_s26, 8  ;;  %s1843_s13 = sadd.s32 1, %s3918_s26 }
  0x43   : > { %v2637_v6 = vld [vmem:[#allocation8 + $0x2e0] sm:$0xf]  ;;  %v3049_v7 = vld [vmem:[#allocation8 + $0x2ec] sm:$0xf0]  ;;  %v2510_v8 = vor.u32 %v3017_v5, %v2509_v3  ;;  %p3964_p4 = scmp.lt.s32.totalorder %s1843_s13, 8  ;;  %s1932_s7 = sadd.s32 2, %s3918_s26 }
  0x44   : > { %v2638_v9 = vor.u32 %v3049_v7, %v2637_v6  ;;  %v2765_v10 = vld [vmem:[#allocation8 + $0x3e0] sm:$0xf]  ;;  %v3081_v11 = vld [vmem:[#allocation8 + $0x3ec] sm:$0xf0]  ;;  %1158 = vmatpush.bf16.msra.mxu0 %v2382_v4  ;;  %s1756_s30 = scalar_select %p1755_p1, 1, 0 }
  0x45   : > { %v2365_v12 = vld [vmem:[#allocation8 + $0xc0] sm:$0xf]  ;;  %v2766_v13 = vor.u32 %v3081_v11, %v2765_v10  ;;  %v2981_v14 = vld [vmem:[#allocation8 + $0xcc] sm:$0xf0]  ;;  %1177 = vmatpush.bf16.msra.mxu1 %v2510_v8  ;;  %s1845_s27 = scalar_select %p3964_p4, 1, 0 }
  0x46   : > { %v2493_v15 = vld [vmem:[#allocation8 + $0x1c0] sm:$0xf]  ;;  %v3013_v16 = vld [vmem:[#allocation8 + $0x1cc] sm:$0xf0]  ;;  %1196 = vmatpush.bf16.msra.mxu2 %v2638_v9  ;;  %v2366_v17 = vor.u32 %v2981_v14, %v2365_v12  ;;  %p3978_p5 = scmp.lt.s32.totalorder %s1932_s7, 8  ;;  %s2021_s11 = sadd.s32 3, %s3918_s26 }
  0x47   : > { %v2494_v18 = vor.u32 %v3013_v16, %v2493_v15  ;;  %v2621_v19 = vld [vmem:[#allocation8 + $0x2c0] sm:$0xf]  ;;  %v3045_v20 = vld [vmem:[#allocation8 + $0x2cc] sm:$0xf0]  ;;  %1215 = vmatpush.bf16.msra.mxu3 %v2766_v13  ;;  %p3989_p6 = scmp.lt.s32.totalorder %s2021_s11, 8 }
  0x48   : > { %v2749_v21 = vld [vmem:[#allocation8 + $0x3c0] sm:$0xf]  ;;  %v2622_v22 = vor.u32 %v3045_v20, %v2621_v19  ;;  %v3077_v23 = vld [vmem:[#allocation8 + $0x3cc] sm:$0xf0]  ;;  %1159 = vmatpush.bf16.msra.mxu0 %v2366_v17  ;;  %s1934_s10 = scalar_select %p3978_p5, 1, 0 }
  0x49   : > { %v2349_v24 = vld [vmem:[#allocation8 + $0xa0] sm:$0xf]  ;;  %v2977_v25 = vld [vmem:[#allocation8 + $0xac] sm:$0xf0]  ;;  %v2750_v26 = vor.u32 %v3077_v23, %v2749_v21  ;;  %1178 = vmatpush.bf16.msra.mxu1 %v2494_v18  ;;  %s2023_s24 = scalar_select %p3989_p6, 1, 0 }
  0x4a   : > { %v2477_v27 = vld [vmem:[#allocation8 + $0x1a0] sm:$0xf]  ;;  %v3009_v28 = vld [vmem:[#allocation8 + $0x1ac] sm:$0xf0]  ;;  %v2350_v30 = vor.u32 %v2977_v25, %v2349_v24  ;;  %1197 = vmatpush.bf16.msra.mxu2 %v2622_v22 }
  0x4b   : > { %v2605_v29 = vld [vmem:[#allocation8 + $0x2a0] sm:$0xf]  ;;  %v3041_v31 = vld [vmem:[#allocation8 + $0x2ac] sm:$0xf0]  ;;  %v2478_v34 = vor.u32 %v3009_v28, %v2477_v27  ;;  %1216 = vmatpush.bf16.msra.mxu3 %v2750_v26 }
  0x4c   : > { %v2733_v32 = vld [vmem:[#allocation8 + $0x3a0] sm:$0xf]  ;;  %v3073_v33 = vld [vmem:[#allocation8 + $0x3ac] sm:$0xf0]  ;;  %v2606_v35 = vor.u32 %v3041_v31, %v2605_v29  ;;  %1160 = vmatpush.bf16.msra.mxu0 %v2350_v30  ;;  %v2947_v31 = vld [vmem:[%s3635_s29 + $0x4] sm:$0xf] }
  0x4d   : > { %v2333_v36 = vld [vmem:[#allocation8 + $0x80] sm:$0xf]  ;;  %v2973_v37 = vld [vmem:[#allocation8 + $0x8c] sm:$0xf0]  ;;  %v2734_v39 = vor.u32 %v3073_v33, %v2733_v32  ;;  %1179 = vmatpush.bf16.msra.mxu1 %v2478_v34  ;;  %v2239_v32 = vld [vmem:[%s3635_s29 + $0x10] sm:$0xf0] }
  0x4e   : > { %v2461_v38 = vld [vmem:[#allocation8 + $0x180] sm:$0xf]  ;;  %v3005_v40 = vld [vmem:[#allocation8 + $0x18c] sm:$0xf0]  ;;  %v2334_v45 = vor.u32 %v2973_v37, %v2333_v36  ;;  %1198 = vmatpush.bf16.msra.mxu2 %v2606_v35  ;;  %v2983_v33 = vld [vmem:[#allocation8 + $0xe4] sm:$0xf] }
  0x4f   : > { %v2589_v41 = vld [vmem:[#allocation8 + $0x280] sm:$0xf]  ;;  %v3037_v42 = vld [vmem:[#allocation8 + $0x28c] sm:$0xf0]  ;;  %v2462_v46 = vor.u32 %v3005_v40, %v2461_v38  ;;  %1217 = vmatpush.bf16.msra.mxu3 %v2734_v39  ;;  %v2383_v34 = vld [vmem:[#allocation8 + $0xf0] sm:$0xf0] }
  0x50   : > { %v2717_v43 = vld [vmem:[#allocation8 + $0x380] sm:$0xf]  ;;  %v3069_v44 = vld [vmem:[#allocation8 + $0x38c] sm:$0xf0]  ;;  %v2590_v47 = vor.u32 %v3037_v42, %v2589_v41  ;;  %1161 = vmatpush.bf16.msra.mxu0 %v2334_v45  ;;  %v2245_v36 = vld [vmem:[%s3635_s29 + $0x8] sm:$0xf]  ;;  %v2386_v45 = vor.u32 %v2983_v33, %v2383_v34 }
  0x51   : > { %v2317_v48 = vld [vmem:[#allocation8 + $0x60] sm:$0xf]  ;;  %v2969_v49 = vld [vmem:[#allocation8 + $0x6c] sm:$0xf0]  ;;  %v2718_v51 = vor.u32 %v3069_v44, %v2717_v43  ;;  %1180 = vmatpush.bf16.msra.mxu1 %v2462_v46  ;;  %v3015_v37 = vld [vmem:[#allocation8 + $0x1e4] sm:$0xf] }
  0x52   : > { %v2445_v50 = vld [vmem:[#allocation8 + $0x160] sm:$0xf]  ;;  %v3001_v52 = vld [vmem:[#allocation8 + $0x16c] sm:$0xf0]  ;;  %v2318_v57 = vor.u32 %v2969_v49, %v2317_v48  ;;  %1199 = vmatpush.bf16.msra.mxu2 %v2590_v47  ;;  %v2511_v38 = vld [vmem:[#allocation8 + $0x1f0] sm:$0xf0] }
  0x53   : > { %v2573_v53 = vld [vmem:[#allocation8 + $0x260] sm:$0xf]  ;;  %v3033_v54 = vld [vmem:[#allocation8 + $0x26c] sm:$0xf0]  ;;  %v2446_v58 = vor.u32 %v3001_v52, %v2445_v50  ;;  %1218 = vmatpush.bf16.msra.mxu3 %v2718_v51  ;;  %v2950_v41 = vld [vmem:[%s3635_s29 + $0x14] sm:$0xf0]  ;;  %v2514_v50 = vor.u32 %v3015_v37, %v2511_v38 }
  0x54   : > { %v2701_v55 = vld [vmem:[#allocation8 + $0x360] sm:$0xf]  ;;  %v3065_v56 = vld [vmem:[#allocation8 + $0x36c] sm:$0xf0]  ;;  %v2574_v59 = vor.u32 %v3033_v54, %v2573_v53  ;;  %1162 = vmatpush.bf16.msra.mxu0 %v2318_v57  ;;  %v2948_v42 = vld [vmem:[%s3635_s29 + $0xc] sm:$0xf]  ;;  %v3661_v54 = vor.u32 %v2947_v31, %v2239_v32 }
  0x55   : > { %v2301_v60 = vld [vmem:[#allocation8 + $0x40] sm:$0xf]  ;;  %v2965_v61 = vld [vmem:[#allocation8 + $0x4c] sm:$0xf0]  ;;  %v2702_v63 = vor.u32 %v3065_v56, %v2701_v55  ;;  %1181 = vmatpush.bf16.msra.mxu1 %v2446_v58  ;;  %v2247_v43 = vld [vmem:[%s3635_s29 + $0x18] sm:$0xf0]  ;;  %v3663_v55 = vor.u32 %v2950_v41, %v2245_v36 }
  0x56   : > { %v2429_v62 = vld [vmem:[#allocation8 + $0x140] sm:$0xf]  ;;  %v2997_v0 = vld [vmem:[#allocation8 + $0x14c] sm:$0xf0]  ;;  %v2302_v5 = vor.u32 %v2965_v61, %v2301_v60  ;;  %1200 = vmatpush.bf16.msra.mxu2 %v2574_v59  ;;  %v3079_v46 = vld [vmem:[#allocation8 + $0x3e4] sm:$0xf]  ;;  %v3665_v58 = vor.u32 %v2948_v42, %v2247_v43 }
  0x57   : > { %v2557_v1 = vld [vmem:[#allocation8 + $0x240] sm:$0xf]  ;;  %v3029_v2 = vld [vmem:[#allocation8 + $0x24c] sm:$0xf0]  ;;  %v2430_v6 = vor.u32 %v2997_v0, %v2429_v62  ;;  %1219 = vmatpush.bf16.msra.mxu3 %v2702_v63  ;;  %v3047_v47 = vld [vmem:[#allocation8 + $0x2e4] sm:$0xf] }
  0x58   : > { %v2685_v3 = vld [vmem:[#allocation8 + $0x340] sm:$0xf]  ;;  %v3061_v4 = vld [vmem:[#allocation8 + $0x34c] sm:$0xf0]  ;;  %v2558_v7 = vor.u32 %v3029_v2, %v2557_v1  ;;  %1163 = vmatpush.bf16.msra.mxu0 %v2302_v5  ;;  %v2639_v48 = vld [vmem:[#allocation8 + $0x2f0] sm:$0xf0] }
  0x59   : > { %v2285_v8 = vld [vmem:[#allocation8 + $0x20] sm:$0xf]  ;;  %v2961_v9 = vld [vmem:[#allocation8 + $0x2c] sm:$0xf0]  ;;  %v2686_v11 = vor.u32 %v3061_v4, %v2685_v3  ;;  %1182 = vmatpush.bf16.msra.mxu1 %v2430_v6  ;;  %v2767_v51 = vld [vmem:[#allocation8 + $0x3f0] sm:$0xf0]  ;;  %v2642_v59 = vor.u32 %v3047_v47, %v2639_v48 }
  0x5a   : > { %v2413_v10 = vld [vmem:[#allocation8 + $0x120] sm:$0xf]  ;;  %v2993_v12 = vld [vmem:[#allocation8 + $0x12c] sm:$0xf0]  ;;  %v2286_v18 = vor.u32 %v2961_v9, %v2285_v8  ;;  %1201 = vmatpush.bf16.msra.mxu2 %v2558_v7  ;;  %v2979_v52 = vld [vmem:[#allocation8 + $0xc4] sm:$0xf]  ;;  %v2770_v60 = vor.u32 %v3079_v46, %v2767_v51 }
  0x5b   : > { %v2541_v13 = vld [vmem:[#allocation8 + $0x220] sm:$0xf]  ;;  %v3025_v14 = vld [vmem:[#allocation8 + $0x22c] sm:$0xf0]  ;;  %v2414_v22 = vor.u32 %v2993_v12, %v2413_v10  ;;  %1220 = vmatpush.bf16.msra.mxu3 %v2686_v11  ;;  %v2367_v53 = vld [vmem:[#allocation8 + $0xd0] sm:$0xf0] }
  0x5c   : > { %v2669_v15 = vld [vmem:[#allocation8 + $0x320] sm:$0xf]  ;;  %v3057_v16 = vld [vmem:[#allocation8 + $0x32c] sm:$0xf0]  ;;  %v2542_v23 = vor.u32 %v3025_v14, %v2541_v13  ;;  %1164 = vmatpush.bf16.msra.mxu0 %v2286_v18  ;;  %v3011_v56 = vld [vmem:[#allocation8 + $0x1c4] sm:$0xf]  ;;  %v2370_v61 = vor.u32 %v2979_v52, %v2367_v53 }
  0x5d   : > { %v2269_v17 = vld [vmem:[#allocation8] sm:$0xf]  ;;  %v2957_v19 = vld [vmem:[#allocation8 + $0xc] sm:$0xf0]  ;;  %v2670_v27 = vor.u32 %v3057_v16, %v2669_v15  ;;  %1183 = vmatpush.bf16.msra.mxu1 %v2414_v22  ;;  %v2495_v57 = vld [vmem:[#allocation8 + $0x1d0] sm:$0xf0] }
  0x5e   : > { %v2397_v20 = vld [vmem:[#allocation8 + $0x100] sm:$0xf]  ;;  %v2989_v21 = vld [vmem:[#allocation8 + $0x10c] sm:$0xf0]  ;;  %v2270_v35 = vor.u32 %v2957_v19, %v2269_v17  ;;  %1202 = vmatpush.bf16.msra.mxu2 %v2542_v23  ;;  %v3075_v62 = vld [vmem:[#allocation8 + $0x3c4] sm:$0xf]  ;;  %v2498_v1 = vor.u32 %v3011_v56, %v2495_v57 }
  0x5f   : > { %v2525_v24 = vld [vmem:[#allocation8 + $0x200] sm:$0xf]  ;;  %v3021_v25 = vld [vmem:[#allocation8 + $0x20c] sm:$0xf0]  ;;  %v2398_v39 = vor.u32 %v2989_v21, %v2397_v20  ;;  %1221 = vmatpush.bf16.msra.mxu3 %v2670_v27  ;;  %v3043_v63 = vld [vmem:[#allocation8 + $0x2c4] sm:$0xf] }
  0x60   : > { %v2653_v26 = vld [vmem:[#allocation8 + $0x300] sm:$0xf]  ;;  %v3053_v28 = vld [vmem:[#allocation8 + $0x30c] sm:$0xf0]  ;;  %v2526_v40 = vor.u32 %v3021_v25, %v2525_v24  ;;  %1165 = vmatpush.bf16.msra.mxu0 %v2270_v35  ;;  %v2623_v0 = vld [vmem:[#allocation8 + $0x2d0] sm:$0xf0] }
  0x61   : > { %v2237_v29 = vld [vmem:[%s3635_s29] sm:$0xf]  ;;  %v2949_v30 = vld [vmem:[%s3635_s29 + $0xc] sm:$0xf0]  ;;  %v2654_v44 = vor.u32 %v3053_v28, %v2653_v26  ;;  %1184 = vmatpush.bf16.msra.mxu1 %v2398_v39  ;;  %v2751_v2 = vld [vmem:[#allocation8 + $0x3d0] sm:$0xf0]  ;;  %v2626_v7 = vor.u32 %v3043_v63, %v2623_v0 }
  0x62   : > { %v3659_v49 = vor.u32 %v2949_v30, %v2237_v29  ;;  %1203 = vmatpush.bf16.msra.mxu2 %v2526_v40  ;;  %v2975_v3 = vld [vmem:[#allocation8 + $0xa4] sm:$0xf]  ;;  %v2351_v4 = vld [vmem:[#allocation8 + $0xb0] sm:$0xf0]  ;;  %v2754_v8 = vor.u32 %v3075_v62, %v2751_v2  ;;  %v2253_v26 = vld [vmem:[%s3635_s29 + $0x20] sm:$0xf] }
  0x63   : > { %1222 = vmatpush.bf16.msra.mxu3 %v2654_v44  ;;  %v3007_v5 = vld [vmem:[#allocation8 + $0x1a4] sm:$0xf]  ;;  %v2479_v6 = vld [vmem:[#allocation8 + $0x1b0] sm:$0xf0]  ;;  %v2354_v9 = vor.u32 %v2975_v3, %v2351_v4  ;;  %v2953_v27 = vld [vmem:[%s3635_s29 + $0x2c] sm:$0xf0] }
  0x64   : > { %1234 = vmatpush.bf16.msrb.mxu0 %v2386_v45  ;;  %1185 = vmatmul.bf16.vlgmr.msra.gmra.mxu1 %v3661_v54  ;;  %v3071_v10 = vld [vmem:[#allocation8 + $0x3a4] sm:$0xf]  ;;  %v2607_v12 = vld [vmem:[#allocation8 + $0x2b0] sm:$0xf0]  ;;  %v2482_v13 = vor.u32 %v3007_v5, %v2479_v6  ;;  %v2261_v33 = vld [vmem:[%s3635_s29 + $0x28] sm:$0xf]  ;;  %v3679_v45 = vor.u32 %v2953_v27, %v2253_v26 }
  0x65   : > { %1166 = vmatmul.bf16.vlgmr.msra.gmra.mxu0 %v3659_v49  ;;  %1253 = vmatpush.bf16.msrb.mxu1 %v2514_v50  ;;  %v3039_v11 = vld [vmem:[#allocation8 + $0x2a4] sm:$0xf]  ;;  %v2735_v14 = vld [vmem:[#allocation8 + $0x3b0] sm:$0xf0]  ;;  %v2954_v37 = vld [vmem:[%s3635_s29 + $0x34] sm:$0xf0] }
  0x66   : > { %1204 = vmatmul.bf16.vlgmr.msra.gmra.mxu2 %v3663_v55  ;;  %1223 = vmatmul.bf16.vlgmr.msra.gmra.mxu3 %v3665_v58  ;;  %v2971_v15 = vld [vmem:[#allocation8 + $0x84] sm:$0xf]  ;;  %v2335_v16 = vld [vmem:[#allocation8 + $0x90] sm:$0xf0]  ;;  %v2610_v19 = vor.u32 %v3039_v11, %v2607_v12  ;;  %v2738_v23 = vor.u32 %v3071_v10, %v2735_v14  ;;  %v2952_v38 = vld [vmem:[%s3635_s29 + $0x2c] sm:$0xf]  ;;  %v3683_v52 = vor.u32 %v2954_v37, %v2261_v33 }
  0x67   : > { %1272 = vmatpush.bf16.msrb.mxu2 %v2642_v59  ;;  %1291 = vmatpush.bf16.msrb.mxu3 %v2770_v60  ;;  %v3003_v17 = vld [vmem:[#allocation8 + $0x184] sm:$0xf]  ;;  %v2463_v18 = vld [vmem:[#allocation8 + $0x190] sm:$0xf0]  ;;  %v2338_v24 = vor.u32 %v2971_v15, %v2335_v16  ;;  %v2263_v39 = vld [vmem:[%s3635_s29 + $0x38] sm:$0xf0] }
  0x68   : > { %1235 = vmatpush.bf16.msrb.mxu0 %v2370_v61  ;;  %v3067_v20 = vld [vmem:[#allocation8 + $0x384] sm:$0xf]  ;;  %v2719_v21 = vld [vmem:[#allocation8 + $0x390] sm:$0xf0]  ;;  %v2466_v28 = vor.u32 %v3003_v17, %v2463_v18  ;;  %v3685_v57 = vor.u32 %v2952_v38, %v2263_v39  ;;  %v3050_v33 = vld [vmem:[#allocation8 + $0x2f4] sm:$0xf0] }
  0x69   : > { %1254 = vmatpush.bf16.msrb.mxu1 %v2498_v1  ;;  %v3035_v22 = vld [vmem:[#allocation8 + $0x284] sm:$0xf]  ;;  %v2591_v25 = vld [vmem:[#allocation8 + $0x290] sm:$0xf0]  ;;  %v2722_v40 = vor.u32 %v3067_v20, %v2719_v21  ;;  %v2986_v20 = vld [vmem:[#allocation8 + $0xf4] sm:$0xf0] }
  0x6a   : > { %v2951_v29 = vld [vmem:[%s3635_s29 + $0x24] sm:$0xf]  ;;  %v2255_v30 = vld [vmem:[%s3635_s29 + $0x30] sm:$0xf0]  ;;  %v2594_v36 = vor.u32 %v3035_v22, %v2591_v25  ;;  %v2517_v22 = vld [vmem:[#allocation8 + $0x1e8] sm:$0xf] }
  0x6b   : > { %1273 = vmatpush.bf16.msrb.mxu2 %v2626_v7  ;;  %1292 = vmatpush.bf16.msrb.mxu3 %v2754_v8  ;;  %v2967_v31 = vld [vmem:[#allocation8 + $0x64] sm:$0xf]  ;;  %v2319_v32 = vld [vmem:[#allocation8 + $0x70] sm:$0xf0]  ;;  %v3681_v51 = vor.u32 %v2951_v29, %v2255_v30 }
  0x6c   : > { %1236 = vmatpush.bf16.msrb.mxu0 %v2354_v9  ;;  %v2999_v34 = vld [vmem:[#allocation8 + $0x164] sm:$0xf]  ;;  %v2447_v35 = vld [vmem:[#allocation8 + $0x170] sm:$0xf0]  ;;  %v2322_v41 = vor.u32 %v2967_v31, %v2319_v32  ;;  %v2645_v32 = vld [vmem:[#allocation8 + $0x2e8] sm:$0xf] }
  0x6d   : > { %1255 = vmatpush.bf16.msrb.mxu1 %v2482_v13  ;;  %v3063_v42 = vld [vmem:[#allocation8 + $0x364] sm:$0xf]  ;;  %v2575_v44 = vld [vmem:[#allocation8 + $0x270] sm:$0xf0]  ;;  %v2450_v46 = vor.u32 %v2999_v34, %v2447_v35  ;;  %v2773_v35 = vld [vmem:[#allocation8 + $0x3e8] sm:$0xf]  ;;  %v2646_v39 = vor.u32 %v3050_v33, %v2645_v32 }
  0x6e   : > { %v3031_v43 = vld [vmem:[#allocation8 + $0x264] sm:$0xf]  ;;  %v2703_v47 = vld [vmem:[#allocation8 + $0x370] sm:$0xf0]  ;;  %v2309_v32 = vld [vmem:[#allocation8 + $0x48] sm:$0xf] }
  0x6f   : > { %1274 = vmatpush.bf16.msrb.mxu2 %v2610_v19  ;;  %1293 = vmatpush.bf16.msrb.mxu3 %v2738_v23  ;;  %v2963_v48 = vld [vmem:[#allocation8 + $0x44] sm:$0xf]  ;;  %v2303_v50 = vld [vmem:[#allocation8 + $0x50] sm:$0xf0]  ;;  %v2578_v59 = vor.u32 %v3031_v43, %v2575_v44  ;;  %v2706_v60 = vor.u32 %v3063_v42, %v2703_v47  ;;  %v2389_v19 = vld [vmem:[#allocation8 + $0xe8] sm:$0xf] }
  0x70   : > { %1237 = vmatpush.bf16.msrb.mxu0 %v2338_v24  ;;  %v2995_v53 = vld [vmem:[#allocation8 + $0x144] sm:$0xf]  ;;  %v2431_v56 = vld [vmem:[#allocation8 + $0x150] sm:$0xf0]  ;;  %v2306_v61 = vor.u32 %v2963_v48, %v2303_v50  ;;  %v3018_v23 = vld [vmem:[#allocation8 + $0x1f4] sm:$0xf0]  ;;  %v2390_v31 = vor.u32 %v2986_v20, %v2389_v19 }
  0x71   : > { %1256 = vmatpush.bf16.msrb.mxu1 %v2466_v28  ;;  %v3059_v62 = vld [vmem:[#allocation8 + $0x344] sm:$0xf]  ;;  %v2559_v0 = vld [vmem:[#allocation8 + $0x250] sm:$0xf0]  ;;  %v2434_v1 = vor.u32 %v2995_v53, %v2431_v56  ;;  %v2518_v34 = vor.u32 %v3018_v23, %v2517_v22  ;;  %v2501_v42 = vld [vmem:[#allocation8 + $0x1c8] sm:$0xf] }
  0x72   : > { %v3027_v63 = vld [vmem:[#allocation8 + $0x244] sm:$0xf]  ;;  %v2687_v2 = vld [vmem:[#allocation8 + $0x350] sm:$0xf0]  ;;  %v3014_v44 = vld [vmem:[#allocation8 + $0x1d4] sm:$0xf0] }
  0x73   : > { %1275 = vmatpush.bf16.msrb.mxu2 %v2594_v36  ;;  %1294 = vmatpush.bf16.msrb.mxu3 %v2722_v40  ;;  %v2959_v3 = vld [vmem:[#allocation8 + $0x24] sm:$0xf]  ;;  %v2287_v4 = vld [vmem:[#allocation8 + $0x30] sm:$0xf0]  ;;  %v2562_v7 = vor.u32 %v3027_v63, %v2559_v0  ;;  %v2690_v9 = vor.u32 %v3059_v62, %v2687_v2  ;;  %v3082_v36 = vld [vmem:[#allocation8 + $0x3f4] sm:$0xf0]  ;;  %v2502_v56 = vor.u32 %v3014_v44, %v2501_v42 }
  0x74   : > { %1238 = vmatpush.bf16.msrb.mxu0 %v2322_v41  ;;  %1190 = vmatmul.bf16.gmra.mxu1 %v3681_v51  ;;  %v2991_v5 = vld [vmem:[#allocation8 + $0x124] sm:$0xf]  ;;  %v2415_v6 = vld [vmem:[#allocation8 + $0x130] sm:$0xf0]  ;;  %v2290_v10 = vor.u32 %v2959_v3, %v2287_v4  ;;  %v2373_v40 = vld [vmem:[#allocation8 + $0xc8] sm:$0xf]  ;;  %v2774_v43 = vor.u32 %v3082_v36, %v2773_v35 }
  0x75   : > { %1171 = vmatmul.bf16.gmra.mxu0 %v3679_v45  ;;  %1257 = vmatpush.bf16.msrb.mxu1 %v2450_v46  ;;  %v3055_v8 = vld [vmem:[#allocation8 + $0x324] sm:$0xf]  ;;  %v2671_v11 = vld [vmem:[#allocation8 + $0x330] sm:$0xf0]  ;;  %v2418_v14 = vor.u32 %v2991_v5, %v2415_v6  ;;  %v2982_v41 = vld [vmem:[#allocation8 + $0xd4] sm:$0xf0] }
  0x76   : > { %1209 = vmatmul.bf16.gmra.mxu2 %v3683_v52  ;;  %1228 = vmatmul.bf16.gmra.mxu3 %v3685_v57  ;;  %v3023_v12 = vld [vmem:[#allocation8 + $0x224] sm:$0xf]  ;;  %v2543_v13 = vld [vmem:[#allocation8 + $0x230] sm:$0xf0]  ;;  %v2674_v24 = vor.u32 %v3055_v8, %v2671_v11  ;;  %v2629_v46 = vld [vmem:[#allocation8 + $0x2c8] sm:$0xf]  ;;  %v2374_v53 = vor.u32 %v2982_v41, %v2373_v40 }
  0x77   : > { %1276 = vmatpush.bf16.msrb.mxu2 %v2578_v59  ;;  %1295 = vmatpush.bf16.msrb.mxu3 %v2706_v60  ;;  %v2955_v15 = vld [vmem:[#allocation8 + $0x4] sm:$0xf]  ;;  %v2271_v16 = vld [vmem:[#allocation8 + $0x10] sm:$0xf0]  ;;  %v2546_v21 = vor.u32 %v3023_v12, %v2543_v13  ;;  %v3046_v47 = vld [vmem:[#allocation8 + $0x2d4] sm:$0xf0] }
  0x78   : > { %1239 = vmatpush.bf16.msrb.mxu0 %v2306_v61  ;;  %v2987_v17 = vld [vmem:[#allocation8 + $0x104] sm:$0xf]  ;;  %v2399_v18 = vld [vmem:[#allocation8 + $0x110] sm:$0xf0]  ;;  %v2274_v25 = vor.u32 %v2955_v15, %v2271_v16  ;;  %v2757_v48 = vld [vmem:[#allocation8 + $0x3c8] sm:$0xf]  ;;  %v2630_v59 = vor.u32 %v3046_v47, %v2629_v46 }
  0x79   : > { %1258 = vmatpush.bf16.msrb.mxu1 %v2434_v1  ;;  %v3051_v26 = vld [vmem:[#allocation8 + $0x304] sm:$0xf]  ;;  %v2527_v28 = vld [vmem:[#allocation8 + $0x210] sm:$0xf0]  ;;  %v2402_v29 = vor.u32 %v2987_v17, %v2399_v18  ;;  %v3078_v50 = vld [vmem:[#allocation8 + $0x3d4] sm:$0xf0] }
  0x7a   : > { %v3019_v27 = vld [vmem:[#allocation8 + $0x204] sm:$0xf]  ;;  %v2655_v30 = vld [vmem:[#allocation8 + $0x310] sm:$0xf0]  ;;  %v2357_v60 = vld [vmem:[#allocation8 + $0xa8] sm:$0xf]  ;;  %v2758_v63 = vor.u32 %v3078_v50, %v2757_v48 }
  0x7b   : > { %1277 = vmatpush.bf16.msrb.mxu2 %v2562_v7  ;;  %1296 = vmatpush.bf16.msrb.mxu3 %v2690_v9  ;;  %v2530_v37 = vor.u32 %v3019_v27, %v2527_v28  ;;  %v2658_v38 = vor.u32 %v3051_v26, %v2655_v30  ;;  %v2978_v61 = vld [vmem:[#allocation8 + $0xb4] sm:$0xf0]  ;;  %v2485_v62 = vld [vmem:[#allocation8 + $0x1a8] sm:$0xf] }
  0x7c   : > { %1240 = vmatpush.bf16.msrb.mxu0 %v2290_v10  ;;  %v3010_v0 = vld [vmem:[#allocation8 + $0x1b4] sm:$0xf0]  ;;  %v2613_v1 = vld [vmem:[#allocation8 + $0x2a8] sm:$0xf]  ;;  %v2358_v5 = vor.u32 %v2978_v61, %v2357_v60 }
  0x7d   : > { %1259 = vmatpush.bf16.msrb.mxu1 %v2418_v14  ;;  %v3042_v2 = vld [vmem:[#allocation8 + $0x2b4] sm:$0xf0]  ;;  %v2741_v3 = vld [vmem:[#allocation8 + $0x3a8] sm:$0xf]  ;;  %v2486_v6 = vor.u32 %v3010_v0, %v2485_v62 }
  0x7e   : > { %v3074_v4 = vld [vmem:[#allocation8 + $0x3b4] sm:$0xf0]  ;;  %v2614_v7 = vor.u32 %v3042_v2, %v2613_v1  ;;  %v2341_v8 = vld [vmem:[#allocation8 + $0x88] sm:$0xf] }
  0x7f   : > { %1278 = vmatpush.bf16.msrb.mxu2 %v2546_v21  ;;  %1297 = vmatpush.bf16.msrb.mxu3 %v2674_v24  ;;  %v2974_v9 = vld [vmem:[#allocation8 + $0x94] sm:$0xf0]  ;;  %v2469_v10 = vld [vmem:[#allocation8 + $0x188] sm:$0xf]  ;;  %v2742_v11 = vor.u32 %v3074_v4, %v2741_v3 }
  0x80   : > { %1241 = vmatpush.bf16.msrb.mxu0 %v2274_v25  ;;  %v3006_v12 = vld [vmem:[#allocation8 + $0x194] sm:$0xf0]  ;;  %v2597_v13 = vld [vmem:[#allocation8 + $0x288] sm:$0xf]  ;;  %v2342_v17 = vor.u32 %v2974_v9, %v2341_v8  ;;  %v2984_v9 = vld [vmem:[#allocation8 + $0xec] sm:$0xf] }
  0x81   : > { %1260 = vmatpush.bf16.msrb.mxu1 %v2402_v29  ;;  %v3038_v14 = vld [vmem:[#allocation8 + $0x294] sm:$0xf0]  ;;  %v2725_v15 = vld [vmem:[#allocation8 + $0x388] sm:$0xf]  ;;  %v2470_v18 = vor.u32 %v3006_v12, %v2469_v10  ;;  %v2391_v10 = vld [vmem:[#allocation8 + $0xf8] sm:$0xf0] }
  0x82   : > { %v3070_v16 = vld [vmem:[#allocation8 + $0x394] sm:$0xf0]  ;;  %v2598_v19 = vor.u32 %v3038_v14, %v2597_v13  ;;  %v2325_v20 = vld [vmem:[#allocation8 + $0x68] sm:$0xf]  ;;  %v2519_v13 = vld [vmem:[#allocation8 + $0x1f8] sm:$0xf0] }
  0x83   : > { %1279 = vmatpush.bf16.msrb.mxu2 %v2530_v37  ;;  %1298 = vmatpush.bf16.msrb.mxu3 %v2658_v38  ;;  %v2970_v21 = vld [vmem:[#allocation8 + $0x74] sm:$0xf0]  ;;  %v2453_v22 = vld [vmem:[#allocation8 + $0x168] sm:$0xf]  ;;  %v2726_v23 = vor.u32 %v3070_v16, %v2725_v15  ;;  %v3080_v14 = vld [vmem:[#allocation8 + $0x3ec] sm:$0xf] }
  0x84   : > { %1310 = vmatpush.bf16.msra.mxu0 %v2390_v31  ;;  %1261 = vmatmul.bf16.vlgmr.msrb.gmra.mxu1 %v3661_v54  ;;  %v3002_v24 = vld [vmem:[#allocation8 + $0x174] sm:$0xf0]  ;;  %v2581_v25 = vld [vmem:[#allocation8 + $0x268] sm:$0xf]  ;;  %v2326_v29 = vor.u32 %v2970_v21, %v2325_v20  ;;  %v2775_v15 = vld [vmem:[#allocation8 + $0x3f8] sm:$0xf0]  ;;  %v2394_v21 = vor.u32 %v2984_v9, %v2391_v10 }
  0x85   : > { %1329 = vmatpush.bf16.msra.mxu1 %v2518_v34  ;;  %1242 = vmatmul.bf16.vlgmr.msrb.gmra.mxu0 %v3659_v49  ;;  %v3034_v26 = vld [vmem:[#allocation8 + $0x274] sm:$0xf0]  ;;  %v2709_v27 = vld [vmem:[#allocation8 + $0x368] sm:$0xf]  ;;  %v2454_v30 = vor.u32 %v3002_v24, %v2453_v22  ;;  %v3064_v9 = vld [vmem:[#allocation8 + $0x36c] sm:$0xf] }
  0x86   : > { %1280 = vmatmul.bf16.vlgmr.msrb.gmra.mxu2 %v3663_v55  ;;  %1299 = vmatmul.bf16.vlgmr.msrb.gmra.mxu3 %v3665_v58  ;;  %v3066_v28 = vld [vmem:[#allocation8 + $0x374] sm:$0xf0]  ;;  %v2582_v31 = vor.u32 %v3034_v26, %v2581_v25  ;;  %v2437_v34 = vld [vmem:[#allocation8 + $0x148] sm:$0xf]  ;;  %v2980_v25 = vld [vmem:[#allocation8 + $0xcc] sm:$0xf] }
  0x87   : > { %1348 = vmatpush.bf16.msra.mxu2 %v2646_v39  ;;  %1367 = vmatpush.bf16.msra.mxu3 %v2774_v43  ;;  %v2966_v33 = vld [vmem:[#allocation8 + $0x54] sm:$0xf0]  ;;  %v2710_v35 = vor.u32 %v3066_v28, %v2709_v27  ;;  %v2565_v37 = vld [vmem:[#allocation8 + $0x248] sm:$0xf]  ;;  %v2375_v26 = vld [vmem:[#allocation8 + $0xd8] sm:$0xf0] }
  0x88   : > { %1311 = vmatpush.bf16.msra.mxu0 %v2374_v53  ;;  %v2998_v36 = vld [vmem:[#allocation8 + $0x154] sm:$0xf0]  ;;  %v2693_v39 = vld [vmem:[#allocation8 + $0x348] sm:$0xf]  ;;  %v2310_v41 = vor.u32 %v2966_v33, %v2309_v32  ;;  %v3012_v27 = vld [vmem:[#allocation8 + $0x1cc] sm:$0xf]  ;;  %v2378_v33 = vor.u32 %v2980_v25, %v2375_v26 }
  0x89   : > { %1330 = vmatpush.bf16.msra.mxu1 %v2502_v56  ;;  %v3030_v38 = vld [vmem:[#allocation8 + $0x254] sm:$0xf0]  ;;  %v2438_v42 = vor.u32 %v2998_v36, %v2437_v34  ;;  %v2293_v44 = vld [vmem:[#allocation8 + $0x28] sm:$0xf]  ;;  %v2503_v28 = vld [vmem:[#allocation8 + $0x1d8] sm:$0xf0] }
  0x8a   : > { %v3062_v40 = vld [vmem:[#allocation8 + $0x354] sm:$0xf0]  ;;  %v2566_v43 = vor.u32 %v3030_v38, %v2565_v37  ;;  %v2421_v47 = vld [vmem:[#allocation8 + $0x128] sm:$0xf]  ;;  %v2631_v32 = vld [vmem:[#allocation8 + $0x2d8] sm:$0xf0]  ;;  %v2506_v34 = vor.u32 %v3012_v27, %v2503_v28 }
  0x8b   : > { %1349 = vmatpush.bf16.msra.mxu2 %v2630_v59  ;;  %1368 = vmatpush.bf16.msra.mxu3 %v2758_v63  ;;  %v2962_v46 = vld [vmem:[#allocation8 + $0x34] sm:$0xf0]  ;;  %v2694_v48 = vor.u32 %v3062_v40, %v2693_v39  ;;  %v2549_v53 = vld [vmem:[#allocation8 + $0x228] sm:$0xf]  ;;  %v2976_v36 = vld [vmem:[#allocation8 + $0xac] sm:$0xf] }
  0x8c   : > { %1312 = vmatpush.bf16.msra.mxu0 %v2358_v5  ;;  %v2994_v50 = vld [vmem:[#allocation8 + $0x134] sm:$0xf0]  ;;  %v2677_v59 = vld [vmem:[#allocation8 + $0x328] sm:$0xf]  ;;  %v2294_v61 = vor.u32 %v2962_v46, %v2293_v44  ;;  %v2359_v37 = vld [vmem:[#allocation8 + $0xb8] sm:$0xf0] }
  0x8d   : > { %1331 = vmatpush.bf16.msra.mxu1 %v2486_v6  ;;  %v3026_v56 = vld [vmem:[#allocation8 + $0x234] sm:$0xf0]  ;;  %v2277_v62 = vld [vmem:[#allocation8 + $0x8] sm:$0xf]  ;;  %v2422_v0 = vor.u32 %v2994_v50, %v2421_v47  ;;  %v3008_v38 = vld [vmem:[#allocation8 + $0x1ac] sm:$0xf]  ;;  %v2362_v46 = vor.u32 %v2976_v36, %v2359_v37 }
  0x8e   : > { %v3058_v60 = vld [vmem:[#allocation8 + $0x334] sm:$0xf0]  ;;  %v2550_v1 = vor.u32 %v3026_v56, %v2549_v53  ;;  %v2405_v2 = vld [vmem:[#allocation8 + $0x108] sm:$0xf]  ;;  %v2487_v40 = vld [vmem:[#allocation8 + $0x1b8] sm:$0xf0] }
  0x8f   : > { %1350 = vmatpush.bf16.msra.mxu2 %v2614_v7  ;;  %1369 = vmatpush.bf16.msra.mxu3 %v2742_v11  ;;  %v2958_v63 = vld [vmem:[#allocation8 + $0x14] sm:$0xf0]  ;;  %v2661_v4 = vld [vmem:[#allocation8 + $0x308] sm:$0xf]  ;;  %v2678_v5 = vor.u32 %v3058_v60, %v2677_v59  ;;  %v3016_v11 = vld [vmem:[#allocation8 + $0x1ec] sm:$0xf]  ;;  %v2490_v47 = vor.u32 %v3008_v38, %v2487_v40 }
  0x90   : > { %1313 = vmatpush.bf16.msra.mxu0 %v2342_v17  ;;  %v2990_v3 = vld [vmem:[#allocation8 + $0x114] sm:$0xf0]  ;;  %v2533_v7 = vld [vmem:[#allocation8 + $0x208] sm:$0xf]  ;;  %v2278_v12 = vor.u32 %v2958_v63, %v2277_v62  ;;  %v2522_v22 = vor.u32 %v3016_v11, %v2519_v13  ;;  %v2615_v44 = vld [vmem:[#allocation8 + $0x2b8] sm:$0xf0] }
  0x91   : > { %1332 = vmatpush.bf16.msra.mxu1 %v2470_v18  ;;  %v3054_v6 = vld [vmem:[#allocation8 + $0x314] sm:$0xf0]  ;;  %v2406_v16 = vor.u32 %v2990_v3, %v2405_v2  ;;  %v3048_v18 = vld [vmem:[#allocation8 + $0x2ec] sm:$0xf]  ;;  %v2343_v53 = vld [vmem:[#allocation8 + $0x98] sm:$0xf0] }
  0x92   : > { %v3022_v8 = vld [vmem:[#allocation8 + $0x214] sm:$0xf0]  ;;  %v2662_v20 = vor.u32 %v3054_v6, %v2661_v4  ;;  %v2972_v50 = vld [vmem:[#allocation8 + $0x8c] sm:$0xf]  ;;  %v2471_v60 = vld [vmem:[#allocation8 + $0x198] sm:$0xf0] }
  0x93   : > { %1351 = vmatpush.bf16.msra.mxu2 %v2598_v19  ;;  %1370 = vmatpush.bf16.msra.mxu3 %v2726_v23  ;;  %v2534_v17 = vor.u32 %v3022_v8, %v2533_v7  ;;  %v2647_v19 = vld [vmem:[#allocation8 + $0x2f8] sm:$0xf0]  ;;  %v2778_v23 = vor.u32 %v3080_v14, %v2775_v15  ;;  %v3004_v56 = vld [vmem:[#allocation8 + $0x18c] sm:$0xf] }
  0x94   : > { %1314 = vmatpush.bf16.msra.mxu0 %v2326_v29  ;;  %1266 = vmatmul.bf16.gmra.mxu1 %v3681_v51  ;;  %v2650_v24 = vor.u32 %v3048_v18, %v2647_v19  ;;  %v3076_v29 = vld [vmem:[#allocation8 + $0x3cc] sm:$0xf]  ;;  %v2727_v62 = vld [vmem:[#allocation8 + $0x398] sm:$0xf0]  ;;  %v2474_v2 = vor.u32 %v3004_v56, %v2471_v60  ;;  %v3113_v56 = vld [vmem:[#allocation10 + $0xec] sm:$0xf0] }
  0x95   : > { %1333 = vmatpush.bf16.msra.mxu1 %v2454_v30  ;;  %1247 = vmatmul.bf16.gmra.mxu0 %v3679_v45  ;;  %v2759_v30 = vld [vmem:[#allocation8 + $0x3d8] sm:$0xf0]  ;;  %v3036_v63 = vld [vmem:[#allocation8 + $0x28c] sm:$0xf] }
  0x96   : > { %1285 = vmatmul.bf16.gmra.mxu2 %v3683_v52  ;;  %1304 = vmatmul.bf16.gmra.mxu3 %v3685_v57  ;;  %v2968_v4 = vld [vmem:[#allocation8 + $0x6c] sm:$0xf]  ;;  %v2455_v8 = vld [vmem:[#allocation8 + $0x178] sm:$0xf0] }
  0x97   : > { %1352 = vmatpush.bf16.msra.mxu2 %v2582_v31  ;;  %1371 = vmatpush.bf16.msra.mxu3 %v2710_v35  ;;  %v3044_v31 = vld [vmem:[#allocation8 + $0x2cc] sm:$0xf]  ;;  %v2762_v35 = vor.u32 %v3076_v29, %v2759_v30  ;;  %v2711_v10 = vld [vmem:[#allocation8 + $0x378] sm:$0xf0] }
  0x98   : > { %1315 = vmatpush.bf16.msra.mxu0 %v2310_v41  ;;  %v2634_v39 = vor.u32 %v3044_v31, %v2631_v32  ;;  %v3072_v41 = vld [vmem:[#allocation8 + $0x3ac] sm:$0xf]  ;;  %v2714_v15 = vor.u32 %v3064_v9, %v2711_v10  ;;  %v2295_v29 = vld [vmem:[#allocation8 + $0x38] sm:$0xf0]  ;;  %v2878_v9 = vld [vmem:[#allocation10 + $0xc0] sm:$0xf] }
  0x99   : > { %1334 = vmatpush.bf16.msra.mxu1 %v2438_v42  ;;  %v2743_v42 = vld [vmem:[#allocation8 + $0x3b8] sm:$0xf0]  ;;  %v3000_v6 = vld [vmem:[#allocation8 + $0x16c] sm:$0xf]  ;;  %v3109_v10 = vld [vmem:[#allocation10 + $0xcc] sm:$0xf0] }
  0x9a   : > { %v3032_v11 = vld [vmem:[#allocation8 + $0x26c] sm:$0xf]  ;;  %v2458_v14 = vor.u32 %v3000_v6, %v2455_v8  ;;  %v2423_v32 = vld [vmem:[#allocation8 + $0x138] sm:$0xf0] }
  0x9b   : > { %1353 = vmatpush.bf16.msra.mxu2 %v2566_v43  ;;  %1372 = vmatpush.bf16.msra.mxu3 %v2694_v48  ;;  %v3040_v43 = vld [vmem:[#allocation8 + $0x2ac] sm:$0xf]  ;;  %v2746_v48 = vor.u32 %v3072_v41, %v2743_v42  ;;  %v2551_v36 = vld [vmem:[#allocation8 + $0x238] sm:$0xf0] }
  0x9c   : > { %1316 = vmatpush.bf16.msra.mxu0 %v2294_v61  ;;  %v2618_v59 = vor.u32 %v3040_v43, %v2615_v44  ;;  %v3068_v61 = vld [vmem:[#allocation8 + $0x38c] sm:$0xf]  ;;  %v2407_v43 = vld [vmem:[#allocation8 + $0x118] sm:$0xf0] }
  0x9d   : > { %1335 = vmatpush.bf16.msra.mxu1 %v2422_v0  ;;  %v2599_v0 = vld [vmem:[#allocation8 + $0x298] sm:$0xf0]  ;;  %v2730_v3 = vor.u32 %v3068_v61, %v2727_v62  ;;  %v2996_v18 = vld [vmem:[#allocation8 + $0x14c] sm:$0xf]  ;;  %v2896_v61 = vld [vmem:[#allocation10 + $0xf0] sm:$0xf0] }
  0x9e   : > { %v2602_v7 = vor.u32 %v3036_v63, %v2599_v0  ;;  %v2960_v28 = vld [vmem:[#allocation8 + $0x2c] sm:$0xf]  ;;  %v2904_v63 = vld [vmem:[#allocation10 + $0xf8] sm:$0xf0] }
  0x9f   : > { %1354 = vmatpush.bf16.msra.mxu2 %v2550_v1  ;;  %1373 = vmatpush.bf16.msra.mxu3 %v2678_v5  ;;  %v2346_v1 = vor.u32 %v2972_v50, %v2343_v53  ;;  %v2327_v5 = vld [vmem:[#allocation8 + $0x78] sm:$0xf0]  ;;  %v2992_v30 = vld [vmem:[#allocation8 + $0x12c] sm:$0xf]  ;;  %v2298_v37 = vor.u32 %v2960_v28, %v2295_v29  ;;  %v2894_v53 = vld [vmem:[#allocation10 + $0xe0] sm:$0xf] }
  0xa0   : > { %1317 = vmatpush.bf16.msra.mxu0 %v2278_v12  ;;  %v2583_v12 = vld [vmem:[#allocation8 + $0x278] sm:$0xf0]  ;;  %v2330_v13 = vor.u32 %v2968_v4, %v2327_v5  ;;  %v2956_v38 = vld [vmem:[#allocation8 + $0xc] sm:$0xf]  ;;  %v2426_v40 = vor.u32 %v2992_v30, %v2423_v32  ;;  %v3707_v5 = vor.u32 %v3113_v56, %v2894_v53  ;;  %v3106_v28 = vld [vmem:[#allocation10 + $0xb4] sm:$0xf0] }
  0xa1   : > { %1336 = vmatpush.bf16.msra.mxu1 %v2406_v16  ;;  %v2964_v16 = vld [vmem:[#allocation8 + $0x4c] sm:$0xf]  ;;  %v2586_v19 = vor.u32 %v3032_v11, %v2583_v12  ;;  %v2535_v50 = vld [vmem:[#allocation8 + $0x218] sm:$0xf0]  ;;  %v3107_v11 = vld [vmem:[#allocation10 + $0xc4] sm:$0xf] }
  0xa2   : > { %v2988_v42 = vld [vmem:[#allocation8 + $0x10c] sm:$0xf]  ;;  %v2880_v12 = vld [vmem:[#allocation10 + $0xd0] sm:$0xf0]  ;;  %v3099_v32 = vld [vmem:[#allocation10 + $0x84] sm:$0xf] }
  0xa3   : > { %1355 = vmatpush.bf16.msra.mxu2 %v2534_v17  ;;  %1374 = vmatpush.bf16.msra.mxu3 %v2662_v20  ;;  %v2311_v17 = vld [vmem:[#allocation8 + $0x58] sm:$0xf0]  ;;  %v3052_v44 = vld [vmem:[#allocation8 + $0x30c] sm:$0xf]  ;;  %v2410_v0 = vor.u32 %v2988_v42, %v2407_v43  ;;  %v3095_v42 = vld [vmem:[#allocation10 + $0x64] sm:$0xf] }
  0xa4   : > { %1386 = vmatpush.bf16.msrb.mxu0 %v2394_v21  ;;  %1337 = vmatmul.bf16.vlgmr.msra.gmra.mxu1 %v3661_v54  ;;  %v2439_v20 = vld [vmem:[#allocation8 + $0x158] sm:$0xf0]  ;;  %v3060_v21 = vld [vmem:[#allocation8 + $0x34c] sm:$0xf]  ;;  %v2314_v25 = vor.u32 %v2964_v16, %v2311_v17  ;;  %v3110_v16 = vld [vmem:[#allocation10 + $0xd4] sm:$0xf0]  ;;  %v3719_v17 = vor.u32 %v3109_v10, %v2878_v9 }
  0xa5   : > { %1405 = vmatpush.bf16.msrb.mxu1 %v2522_v22  ;;  %1318 = vmatmul.bf16.vlgmr.msra.gmra.mxu0 %v3659_v49  ;;  %v2695_v22 = vld [vmem:[#allocation8 + $0x358] sm:$0xf0]  ;;  %v2442_v26 = vor.u32 %v2996_v18, %v2439_v20  ;;  %v3112_v62 = vld [vmem:[#allocation10 + $0xec] sm:$0xf]  ;;  %v3721_v18 = vor.u32 %v3107_v11, %v2880_v12  ;;  %v2862_v20 = vld [vmem:[#allocation10 + $0xa0] sm:$0xf] }
  0xa6   : > { %1356 = vmatmul.bf16.vlgmr.msra.gmra.mxu2 %v3663_v55  ;;  %1375 = vmatmul.bf16.vlgmr.msra.gmra.mxu3 %v3665_v58  ;;  %v2698_v27 = vor.u32 %v3060_v21, %v2695_v22  ;;  %v3105_v21 = vld [vmem:[#allocation10 + $0xac] sm:$0xf0]  ;;  %v3103_v22 = vld [vmem:[#allocation10 + $0xa4] sm:$0xf]  ;;  %v2798_v12 = vld [vmem:[#allocation10 + $0x20] sm:$0xf] }
  0xa7   : > { %1443 = vmatpush.bf16.msrb.mxu3 %v2778_v23  ;;  %1424 = vmatpush.bf16.msrb.mxu2 %v2650_v24  ;;  %v3028_v23 = vld [vmem:[#allocation8 + $0x24c] sm:$0xf]  ;;  %v2567_v24 = vld [vmem:[#allocation8 + $0x258] sm:$0xf0]  ;;  %v3732_v29 = vor.u32 %v3105_v21, %v2862_v20 }
  0xa8   : > { %1387 = vmatpush.bf16.msrb.mxu0 %v2378_v33  ;;  %v2570_v31 = vor.u32 %v3028_v23, %v2567_v24  ;;  %v3056_v33 = vld [vmem:[#allocation8 + $0x32c] sm:$0xf]  ;;  %v2864_v24 = vld [vmem:[#allocation10 + $0xb0] sm:$0xf0]  ;;  %v2808_v21 = vld [vmem:[#allocation10 + $0x38] sm:$0xf0] }
  0xa9   : > { %1406 = vmatpush.bf16.msrb.mxu1 %v2506_v34  ;;  %v2679_v34 = vld [vmem:[#allocation8 + $0x338] sm:$0xf0]  ;;  %v3088_v20 = vld [vmem:[#allocation10 + $0x2c] sm:$0xf] }
  0xaa   : > { %v2682_v41 = vor.u32 %v3056_v33, %v2679_v34  ;;  %v3100_v33 = vld [vmem:[#allocation10 + $0x8c] sm:$0xf]  ;;  %v2856_v34 = vld [vmem:[#allocation10 + $0x98] sm:$0xf0] }
  0xab   : > { %1444 = vmatpush.bf16.msrb.mxu3 %v2762_v35  ;;  %1425 = vmatpush.bf16.msrb.mxu2 %v2634_v39  ;;  %v3024_v35 = vld [vmem:[#allocation8 + $0x22c] sm:$0xf]  ;;  %v2279_v39 = vld [vmem:[#allocation8 + $0x18] sm:$0xf0] }
  0xac   : > { %1388 = vmatpush.bf16.msrb.mxu0 %v2362_v46  ;;  %v2554_v46 = vor.u32 %v3024_v35, %v2551_v36  ;;  %v2282_v60 = vor.u32 %v2956_v38, %v2279_v39  ;;  %v2854_v35 = vld [vmem:[#allocation10 + $0x88] sm:$0xf]  ;;  %v3102_v36 = vld [vmem:[#allocation10 + $0x94] sm:$0xf0]  ;;  %v3750_v39 = vor.u32 %v3100_v33, %v2856_v34 }
  0xad   : > { %1407 = vmatpush.bf16.msrb.mxu1 %v2490_v47  ;;  %v2663_v47 = vld [vmem:[#allocation8 + $0x318] sm:$0xf0]  ;;  %v3753_v43 = vor.u32 %v3102_v36, %v2854_v35  ;;  %v3804_v36 = vld [vmem:[#allocation11] sm:$0xf] }
  0xaf   : > { %1445 = vmatpush.bf16.msrb.mxu3 %v2746_v48  ;;  %1426 = vmatpush.bf16.msrb.mxu2 %v2618_v59  ;;  %v3020_v48 = vld [vmem:[#allocation8 + $0x20c] sm:$0xf]  ;;  %v3111_v59 = vld [vmem:[#allocation10 + $0xe4] sm:$0xf] }
  0xb0   : > { %1389 = vmatpush.bf16.msrb.mxu0 %v2346_v1  ;;  %v2666_v1 = vor.u32 %v3052_v44, %v2663_v47  ;;  %v2538_v4 = vor.u32 %v3020_v48, %v2535_v50  ;;  %v3709_v6 = vor.u32 %v3111_v59, %v2896_v61  ;;  %v2832_v44 = vld [vmem:[#allocation10 + $0x70] sm:$0xf0]  ;;  %v2840_v47 = vld [vmem:[#allocation10 + $0x78] sm:$0xf0]  ;;  %v2838_v48 = vld [vmem:[#allocation10 + $0x68] sm:$0xf] }
  0xb1   : > { %1408 = vmatpush.bf16.msrb.mxu1 %v2474_v2  ;;  %v2902_v2 = vld [vmem:[#allocation10 + $0xe8] sm:$0xf]  ;;  %v3098_v50 = vld [vmem:[#allocation10 + $0x74] sm:$0xf0]  ;;  %v3760_v56 = vor.u32 %v3095_v42, %v2832_v44  ;;  %v3093_v61 = vld [vmem:[#allocation10 + $0x4c] sm:$0xf0] }
  0xb2   : > { %v470_v42 = vperm.slane %v3804_v36, 0 }
  0xb3   : > { %1446 = vmatpush.bf16.msrb.mxu3 %v2730_v3  ;;  %1427 = vmatpush.bf16.msrb.mxu2 %v2602_v7  ;;  %v3114_v3 = vld [vmem:[#allocation10 + $0xf4] sm:$0xf0]  ;;  %v3711_v7 = vor.u32 %v3112_v62, %v2904_v63  ;;  %v3091_v62 = vld [vmem:[#allocation10 + $0x44] sm:$0xf]  ;;  %v3765_v63 = vor.u32 %v3098_v50, %v2838_v48 }
  0xb4   : > { %1390 = vmatpush.bf16.msrb.mxu0 %v2330_v13  ;;  %1342 = vmatmul.bf16.gmra.mxu1 %v3681_v51  ;;  %v3713_v8 = vor.u32 %v3114_v3, %v2902_v2  ;;  %v3108_v13 = vld [vmem:[#allocation10 + $0xcc] sm:$0xf]  ;;  %v2824_v2 = vld [vmem:[#allocation10 + $0x58] sm:$0xf0]  ;;  %v2822_v3 = vld [vmem:[#allocation10 + $0x48] sm:$0xf] }
  0xb5   : > { %1409 = vmatpush.bf16.msrb.mxu1 %v2458_v14  ;;  %1323 = vmatmul.bf16.gmra.mxu0 %v3679_v45  ;;  %v2888_v14 = vld [vmem:[#allocation10 + $0xd8] sm:$0xf0] }
  0xb6   : > { %1361 = vmatmul.bf16.gmra.mxu2 %v3683_v52  ;;  %1380 = vmatmul.bf16.gmra.mxu3 %v3685_v57 }
  0xb7   : > { %1447 = vmatpush.bf16.msrb.mxu3 %v2714_v15  ;;  %1428 = vmatpush.bf16.msrb.mxu2 %v2586_v19  ;;  %v2886_v15 = vld [vmem:[#allocation10 + $0xc8] sm:$0xf]  ;;  %v3723_v19 = vor.u32 %v3108_v13, %v2888_v14  ;;  %v3089_v13 = vld [vmem:[#allocation10 + $0x2c] sm:$0xf0]  ;;  %v3087_v14 = vld [vmem:[#allocation10 + $0x24] sm:$0xf] }
  0xb8   : > { %1391 = vmatpush.bf16.msrb.mxu0 %v2314_v25  ;;  %v3726_v23 = vor.u32 %v3110_v16, %v2886_v15  ;;  %v3104_v25 = vld [vmem:[#allocation10 + $0xac] sm:$0xf]  ;;  %v2800_v16 = vld [vmem:[#allocation10 + $0x30] sm:$0xf0] }
  0xb9   : > { %1410 = vmatpush.bf16.msrb.mxu1 %v2442_v26  ;;  %v2872_v26 = vld [vmem:[#allocation10 + $0xb8] sm:$0xf0] }
  0xba   : > { %v3738_v30 = vor.u32 %v3104_v25, %v2872_v26  ;;  %v3784_v25 = vor.u32 %v3089_v13, %v2798_v12  ;;  %v3790_v26 = vor.u32 %v3088_v20, %v2808_v21 }
  0xbb   : > { %1448 = vmatpush.bf16.msrb.mxu3 %v2698_v27  ;;  %1429 = vmatpush.bf16.msrb.mxu2 %v2570_v31  ;;  %v2870_v27 = vld [vmem:[#allocation10 + $0xa8] sm:$0xf]  ;;  %v2846_v31 = vld [vmem:[#allocation10 + $0x80] sm:$0xf] }
  0xbc   : > { %1392 = vmatpush.bf16.msrb.mxu0 %v2298_v37 }
  0xbd   : > { %1411 = vmatpush.bf16.msrb.mxu1 %v2426_v40  ;;  %v2830_v40 = vld [vmem:[#allocation10 + $0x60] sm:$0xf] }
  0xbf   : > { %1449 = vmatpush.bf16.msrb.mxu3 %v2682_v41  ;;  %1430 = vmatpush.bf16.msrb.mxu2 %v2554_v46  ;;  %v3097_v41 = vld [vmem:[#allocation10 + $0x6c] sm:$0xf0]  ;;  %v3096_v46 = vld [vmem:[#allocation10 + $0x6c] sm:$0xf] }
  0xc0   : > { %1393 = vmatpush.bf16.msrb.mxu0 %v2282_v60  ;;  %v3756_v53 = vor.u32 %v3097_v41, %v2830_v40  ;;  %v3762_v59 = vor.u32 %v3096_v46, %v2840_v47  ;;  %v2814_v60 = vld [vmem:[#allocation10 + $0x40] sm:$0xf]  ;;  %v3809_v41 = vld [vmem:[#allocation3] sm:$0xff] }
  0xc1   : > { %1412 = vmatpush.bf16.msrb.mxu1 %v2410_v0  ;;  %v2816_v0 = vld [vmem:[#allocation10 + $0x50] sm:$0xf0]  ;;  %v3768_v9 = vor.u32 %v3093_v61, %v2814_v60  ;;  %v1488_v44 = vpack.c.bf16 %v3809_v41, %v3809_v41 }
  0xc2   : > { %v3772_v10 = vor.u32 %v3091_v62, %v2816_v0 }
  0xc3   : > { %1450 = vmatpush.bf16.msrb.mxu3 %v2666_v1  ;;  %1431 = vmatpush.bf16.msrb.mxu2 %v2538_v4  ;;  %v3092_v1 = vld [vmem:[#allocation10 + $0x4c] sm:$0xf]  ;;  %v3094_v4 = vld [vmem:[#allocation10 + $0x54] sm:$0xf0] }
  0xc4   : > { %1681 = vmatpush.bf16.msra.mxu0 %v3707_v5  ;;  %1413 = vmatmul.bf16.vlgmr.msrb.gmra.mxu1 %v3661_v54  ;;  %v3101_v54 = vld [vmem:[#allocation10 + $0x8c] sm:$0xf0]  ;;  %v3774_v11 = vor.u32 %v3092_v1, %v2824_v2  ;;  %v3778_v15 = vor.u32 %v3094_v4, %v2822_v3 }
  0xc5   : > { %1694 = vmatpush.bf16.msra.mxu1 %v3709_v6  ;;  %1394 = vmatmul.bf16.vlgmr.msrb.gmra.mxu0 %v3659_v49  ;;  %v3736_v49 = vor.u32 %v3103_v22, %v2864_v24  ;;  %v3744_v37 = vor.u32 %v3101_v54, %v2846_v31  ;;  %v2806_v22 = vld [vmem:[#allocation10 + $0x28] sm:$0xf]  ;;  %v3090_v24 = vld [vmem:[#allocation10 + $0x34] sm:$0xf0]  ;;  %v3084_v31 = vld [vmem:[#allocation10 + $0xc] sm:$0xf] }
  0xc6   : > { %1432 = vmatmul.bf16.vlgmr.msrb.gmra.mxu2 %v3663_v55  ;;  %1451 = vmatmul.bf16.vlgmr.msrb.gmra.mxu3 %v3665_v58  ;;  %v3741_v55 = vor.u32 %v3106_v28, %v2870_v27  ;;  %v2848_v58 = vld [vmem:[#allocation10 + $0x90] sm:$0xf0]  ;;  %v2782_v27 = vld [vmem:[#allocation10] sm:$0xf]  ;;  %v3083_v28 = vld [vmem:[#allocation10 + $0x4] sm:$0xf] }
  0xc7   : > { %1720 = vmatpush.bf16.msra.mxu3 %v3711_v7  ;;  %1707 = vmatpush.bf16.msra.mxu2 %v3713_v8  ;;  %v3748_v38 = vor.u32 %v3099_v32, %v2848_v58  ;;  %v2792_v54 = vld [vmem:[#allocation10 + $0x18] sm:$0xf0]  ;;  %v2790_v32 = vld [vmem:[#allocation10 + $0x8] sm:$0xf]  ;;  %v3086_v58 = vld [vmem:[#allocation10 + $0x14] sm:$0xf0] }
  0xc8   : > { %1682 = vmatpush.bf16.msra.mxu0 %v3719_v17  ;;  %v3802_v35 = vor.u32 %v3084_v31, %v2792_v54  ;;  %v3807_v40 = vor.u32 %v3086_v58, %v2790_v32 }
  0xc9   : > { %1695 = vmatpush.bf16.msra.mxu1 %v3721_v18 }
  0xcb   : > { %1721 = vmatpush.bf16.msra.mxu3 %v3723_v19  ;;  %1708 = vmatpush.bf16.msra.mxu2 %v3726_v23 }
  0xcc   : > { %1683 = vmatpush.bf16.msra.mxu0 %v3732_v29 }
  0xcd   : > { %1696 = vmatpush.bf16.msra.mxu1 %v3736_v49 }
  0xcf   : > { %1722 = vmatpush.bf16.msra.mxu3 %v3738_v30  ;;  %1709 = vmatpush.bf16.msra.mxu2 %v3741_v55 }
  0xd0   : > { %1684 = vmatpush.bf16.msra.mxu0 %v3744_v37 }
  0xd1   : > { %1697 = vmatpush.bf16.msra.mxu1 %v3748_v38 }
  0xd3   : > { %1723 = vmatpush.bf16.msra.mxu3 %v3750_v39  ;;  %1710 = vmatpush.bf16.msra.mxu2 %v3753_v43 }
  0xd4   : > { %1685 = vmatpush.bf16.msra.mxu0 %v3756_v53  ;;  %1418 = vmatmul.bf16.gmra.mxu1 %v3681_v51  ;;  %v3085_v51 = vld [vmem:[#allocation10 + $0xc] sm:$0xf0] }
  0xd5   : > { %1698 = vmatpush.bf16.msra.mxu1 %v3760_v56  ;;  %1399 = vmatmul.bf16.gmra.mxu0 %v3679_v45  ;;  %v3788_v45 = vor.u32 %v3087_v14, %v2800_v16  ;;  %v3796_v33 = vor.u32 %v3085_v51, %v2782_v27 }
  0xd6   : > { %1437 = vmatmul.bf16.gmra.mxu2 %v3683_v52  ;;  %1456 = vmatmul.bf16.gmra.mxu3 %v3685_v57  ;;  %v3793_v52 = vor.u32 %v3090_v24, %v2806_v22  ;;  %v2784_v57 = vld [vmem:[#allocation10 + $0x10] sm:$0xf0] }
  0xd7   : > { %1724 = vmatpush.bf16.msra.mxu3 %v3762_v59  ;;  %1711 = vmatpush.bf16.msra.mxu2 %v3765_v63  ;;  %v3800_v34 = vor.u32 %v3083_v28, %v2784_v57 }
  0xd8   : > { %1686 = vmatpush.bf16.msra.mxu0 %v3768_v9 }
  0xd9   : > { %1699 = vmatpush.bf16.msra.mxu1 %v3772_v10 }
  0xdb   : > { %1725 = vmatpush.bf16.msra.mxu3 %v3774_v11  ;;  %1712 = vmatpush.bf16.msra.mxu2 %v3778_v15 }
  0xdc   : > { %1687 = vmatpush.bf16.msra.mxu0 %v3784_v25 }
  0xdd   : > { %1700 = vmatpush.bf16.msra.mxu1 %v3788_v45 }
  0xdf   : > { %1726 = vmatpush.bf16.msra.mxu3 %v3790_v26  ;;  %1713 = vmatpush.bf16.msra.mxu2 %v3793_v52 }
  0xe0   : > { %1688 = vmatpush.bf16.msra.mxu0 %v3796_v33 }
  0xe1   : > { %1701 = vmatpush.bf16.msra.mxu1 %v3800_v34  ;;  %v1186_v48 = vpop.f32.mrf.mxu1 }
  0xe2   : > { %v1167_v46 = vpop.f32.mrf.mxu0 }
  0xe3   : > { %1727 = vmatpush.bf16.msra.mxu3 %v3802_v35  ;;  %1714 = vmatpush.bf16.msra.mxu2 %v3807_v40  ;;  %v1168_v47 = vadd.f32 %v1167_v46, %v470_v42 }
  0xe4   : > { %1769 = vmatpush.bf16.msrb.mxu0 %v3707_v5  ;;  %1702 = vmatmul.bf16.vlgmr.msra.gmra.mxu1 %v1488_v44 }
  0xe5   : > { %1782 = vmatpush.bf16.msrb.mxu1 %v3709_v6  ;;  %v1187_v50 = vadd.f32 %v1186_v48, %v1168_v47  ;;  %1689 = vmatmul.bf16.vlgmr.msra.gmra.mxu0 %v1488_v44 }
  0xe6   : > { %1715 = vmatmul.bf16.vlgmr.msra.gmra.mxu2 %v1488_v44  ;;  %1728 = vmatmul.bf16.vlgmr.msra.gmra.mxu3 %v1488_v44  ;;  %v471_v44 = vperm.slane %v3804_v36, 1 }
  0xe7   : > { %1795 = vmatpush.bf16.msrb.mxu2 %v3713_v8  ;;  %1808 = vmatpush.bf16.msrb.mxu3 %v3711_v7 }
  0xe8   : > { %1770 = vmatpush.bf16.msrb.mxu0 %v3719_v17 }
  0xe9   : > { %1783 = vmatpush.bf16.msrb.mxu1 %v3721_v18  ;;  %v1205_v60 = vpop.f32.mrf.mxu2  ;;  %v1224_v62 = vpop.f32.mrf.mxu3 }
  0xea   : > { %v1206_v61 = vadd.f32 %v1205_v60, %v1187_v50  ;;  %v1169_v0 = vpop.f32.mrf.mxu0  ;;  %v1188_v2 = vpop.f32.mrf.mxu1 }
  0xeb   : > { %1796 = vmatpush.bf16.msrb.mxu2 %v3726_v23  ;;  %1809 = vmatpush.bf16.msrb.mxu3 %v3723_v19  ;;  %v1170_v1 = vadd.f32 %v1169_v0, %v470_v42 }
  0xec   : > { %1771 = vmatpush.bf16.msrb.mxu0 %v3732_v29  ;;  %v3827_v3 = vadd.f32 %v1224_v62, %v1206_v61 }
  0xed   : > { %1784 = vmatpush.bf16.msrb.mxu1 %v3736_v49  ;;  %v1189_v4 = vadd.f32 %v1188_v2, %v1170_v1 }
  0xef   : > { %1797 = vmatpush.bf16.msrb.mxu2 %v3741_v55  ;;  %1810 = vmatpush.bf16.msrb.mxu3 %v3738_v30 }
  0xf0   : > { %1772 = vmatpush.bf16.msrb.mxu0 %v3744_v37 }
  0xf1   : > { %1785 = vmatpush.bf16.msrb.mxu1 %v3748_v38  ;;  %v1207_v12 = vpop.f32.mrf.mxu2  ;;  %v1226_v14 = vpop.f32.mrf.mxu3 }
  0xf2   : > { %v1208_v13 = vadd.f32 %v1207_v12, %v1189_v4  ;;  %v1172_v16 = vpop.f32.mrf.mxu0  ;;  %v1191_v21 = vpop.f32.mrf.mxu1 }
  0xf3   : > { %1798 = vmatpush.bf16.msrb.mxu2 %v3753_v43  ;;  %1811 = vmatpush.bf16.msrb.mxu3 %v3750_v39  ;;  %v1173_v20 = vadd.f32 %v1172_v16, %v470_v42 }
  0xf4   : > { %1773 = vmatpush.bf16.msrb.mxu0 %v3756_v53  ;;  %v3837_v22 = vadd.f32 %v1226_v14, %v1208_v13 }
  0xf5   : > { %1786 = vmatpush.bf16.msrb.mxu1 %v3760_v56  ;;  %v1192_v24 = vadd.f32 %v1191_v21, %v1173_v20 }
  0xf7   : > { %1799 = vmatpush.bf16.msrb.mxu2 %v3765_v63  ;;  %1812 = vmatpush.bf16.msrb.mxu3 %v3762_v59 }
  0xf8   : > { %1774 = vmatpush.bf16.msrb.mxu0 %v3768_v9 }
  0xf9   : > { %1787 = vmatpush.bf16.msrb.mxu1 %v3772_v10  ;;  %v1210_v27 = vpop.f32.mrf.mxu2  ;;  %v1229_v28 = vpop.f32.mrf.mxu3 }
  0xfa   : > { %v1211_v51 = vadd.f32 %v1210_v27, %v1192_v24  ;;  %v1174_v57 = vpop.f32.mrf.mxu0  ;;  %v1193_v54 = vpop.f32.mrf.mxu1 }
  0xfb   : > { %1800 = vmatpush.bf16.msrb.mxu2 %v3778_v15  ;;  %1813 = vmatpush.bf16.msrb.mxu3 %v3774_v11  ;;  %v1175_v31 = vadd.f32 %v1174_v57, %v470_v42 }
  0xfc   : > { %1775 = vmatpush.bf16.msrb.mxu0 %v3784_v25  ;;  %v3847_v32 = vadd.f32 %v1229_v28, %v1211_v51 }
  0xfd   : > { %1788 = vmatpush.bf16.msrb.mxu1 %v3788_v45  ;;  %v1194_v58 = vadd.f32 %v1193_v54, %v1175_v31 }
  0xfe   : > { %4029 = vst [vmem:[#allocation19_spill] sm:$0xff] %v3847_v32 }
  0xff   : > { %1801 = vmatpush.bf16.msrb.mxu2 %v3793_v52  ;;  %1814 = vmatpush.bf16.msrb.mxu3 %v3790_v26 }
 0x100   : > { %1776 = vmatpush.bf16.msrb.mxu0 %v3796_v33 }
 0x101   : > { %1789 = vmatpush.bf16.msrb.mxu1 %v3800_v34  ;;  %v1212_v42 = vpop.f32.mrf.mxu2  ;;  %v1231_v47 = vpop.f32.mrf.mxu3 }
 0x102   : > { %v1213_v46 = vadd.f32 %v1212_v42, %v1194_v58  ;;  %v1243_v48 = vpop.f32.mrf.mxu0  ;;  %v1262_v60 = vpop.f32.mrf.mxu1 }
 0x103   : > { %1802 = vmatpush.bf16.msrb.mxu2 %v3807_v40  ;;  %1815 = vmatpush.bf16.msrb.mxu3 %v3802_v35  ;;  %v1244_v50 = vadd.f32 %v1243_v48, %v471_v44 }
 0x104   : > { %1858 = vmatpush.bf16.msra.mxu0 %v3707_v5  ;;  %v3861_v61 = vadd.f32 %v1231_v47, %v1213_v46 }
 0x105   : > { %1871 = vmatpush.bf16.msra.mxu1 %v3709_v6  ;;  %v1263_v62 = vadd.f32 %v1262_v60, %v1244_v50 }
 0x106   : > { %4030 = vst [vmem:[#allocation20_spill] sm:$0xff] %v3861_v61 }
 0x107   : > { %1884 = vmatpush.bf16.msra.mxu2 %v3713_v8  ;;  %1897 = vmatpush.bf16.msra.mxu3 %v3711_v7 }
 0x108   : > { %1859 = vmatpush.bf16.msra.mxu0 %v3719_v17 }
 0x109   : > { %1872 = vmatpush.bf16.msra.mxu1 %v3721_v18  ;;  %v1281_v0 = vpop.f32.mrf.mxu2  ;;  %v1300_v2 = vpop.f32.mrf.mxu3 }
 0x10a   : > { %v1282_v1 = vadd.f32 %v1281_v0, %v1263_v62  ;;  %v1245_v4 = vpop.f32.mrf.mxu0  ;;  %v1264_v13 = vpop.f32.mrf.mxu1  ;;  %v472_v62 = vperm.slane %v3804_v36, 2 }
 0x10b   : > { %1885 = vmatpush.bf16.msra.mxu2 %v3726_v23  ;;  %1898 = vmatpush.bf16.msra.mxu3 %v3723_v19  ;;  %v1246_v12 = vadd.f32 %v1245_v4, %v471_v44 }
 0x10c   : > { %1860 = vmatpush.bf16.msra.mxu0 %v3732_v29  ;;  %v3871_v14 = vadd.f32 %v1300_v2, %v1282_v1 }
 0x10d   : > { %1873 = vmatpush.bf16.msra.mxu1 %v3736_v49  ;;  %v1265_v16 = vadd.f32 %v1264_v13, %v1246_v12 }
 0x10f   : > { %1886 = vmatpush.bf16.msra.mxu2 %v3741_v55  ;;  %1899 = vmatpush.bf16.msra.mxu3 %v3738_v30 }
 0x110   : > { %1861 = vmatpush.bf16.msra.mxu0 %v3744_v37 }
 0x111   : > { %1874 = vmatpush.bf16.msra.mxu1 %v3748_v38  ;;  %v1283_v20 = vpop.f32.mrf.mxu2  ;;  %v1302_v24 = vpop.f32.mrf.mxu3 }
 0x112   : > { %v1284_v21 = vadd.f32 %v1283_v20, %v1265_v16  ;;  %v1248_v27 = vpop.f32.mrf.mxu0  ;;  %v1267_v28 = vpop.f32.mrf.mxu1 }
 0x113   : > { %1887 = vmatpush.bf16.msra.mxu2 %v3753_v43  ;;  %1900 = vmatpush.bf16.msra.mxu3 %v3750_v39  ;;  %v1249_v51 = vadd.f32 %v1248_v27, %v471_v44 }
 0x114   : > { %1862 = vmatpush.bf16.msra.mxu0 %v3756_v53  ;;  %v3881_v57 = vadd.f32 %v1302_v24, %v1284_v21 }
 0x115   : > { %1875 = vmatpush.bf16.msra.mxu1 %v3760_v56  ;;  %v1268_v31 = vadd.f32 %v1267_v28, %v1249_v51 }
 0x117   : > { %1888 = vmatpush.bf16.msra.mxu2 %v3765_v63  ;;  %1901 = vmatpush.bf16.msra.mxu3 %v3762_v59 }
 0x118   : > { %1863 = vmatpush.bf16.msra.mxu0 %v3768_v9 }
 0x119   : > { %1876 = vmatpush.bf16.msra.mxu1 %v3772_v10  ;;  %v1286_v54 = vpop.f32.mrf.mxu2  ;;  %v1305_v42 = vpop.f32.mrf.mxu3 }
 0x11a   : > { %v1287_v58 = vadd.f32 %v1286_v54, %v1268_v31  ;;  %v1250_v46 = vpop.f32.mrf.mxu0  ;;  %v1269_v48 = vpop.f32.mrf.mxu1 }
 0x11b   : > { %1889 = vmatpush.bf16.msra.mxu2 %v3778_v15  ;;  %1902 = vmatpush.bf16.msra.mxu3 %v3774_v11  ;;  %v1251_v47 = vadd.f32 %v1250_v46, %v471_v44 }
 0x11c   : > { %1864 = vmatpush.bf16.msra.mxu0 %v3784_v25  ;;  %v3891_v50 = vadd.f32 %v1305_v42, %v1287_v58 }
 0x11d   : > { %1877 = vmatpush.bf16.msra.mxu1 %v3788_v45  ;;  %v1270_v60 = vadd.f32 %v1269_v48, %v1251_v47 }
 0x11e   : > { %4031 = vst [vmem:[#allocation21_spill] sm:$0xff] %v3891_v50 }
 0x11f   : > { %1890 = vmatpush.bf16.msra.mxu2 %v3793_v52  ;;  %1903 = vmatpush.bf16.msra.mxu3 %v3790_v26 }
 0x120   : > { %1865 = vmatpush.bf16.msra.mxu0 %v3796_v33 }
 0x121   : > { %1878 = vmatpush.bf16.msra.mxu1 %v3800_v34  ;;  %v1288_v0 = vpop.f32.mrf.mxu2  ;;  %v1307_v2 = vpop.f32.mrf.mxu3 }
 0x122   : > { %v1289_v1 = vadd.f32 %v1288_v0, %v1270_v60  ;;  %v1319_v44 = vpop.f32.mrf.mxu0  ;;  %v1338_v12 = vpop.f32.mrf.mxu1 }
 0x123   : > { %1891 = vmatpush.bf16.msra.mxu2 %v3807_v40  ;;  %1904 = vmatpush.bf16.msra.mxu3 %v3802_v35  ;;  %v1320_v4 = vadd.f32 %v1319_v44, %v472_v62 }
 0x124   : > { %v3898_v13 = vadd.f32 %v1307_v2, %v1289_v1 }
 0x125   : > { %v1339_v16 = vadd.f32 %v1338_v12, %v1320_v4 }
 0x126   : > { %4032 = vst [vmem:[#allocation22_spill] sm:$0xff] %v3898_v13 }
 0x129   : > { %v1357_v20 = vpop.f32.mrf.mxu2  ;;  %v1376_v24 = vpop.f32.mrf.mxu3 }
 0x12a   : > { %v1358_v21 = vadd.f32 %v1357_v20, %v1339_v16  ;;  %v1321_v27 = vpop.f32.mrf.mxu0  ;;  %v1340_v28 = vpop.f32.mrf.mxu1 }
 0x12b   : > { %v1322_v51 = vadd.f32 %v1321_v27, %v472_v62 }
 0x12c   : > { %v3900_v31 = vadd.f32 %v1376_v24, %v1358_v21 }
 0x12d   : > { %v1341_v54 = vadd.f32 %v1340_v28, %v1322_v51 }
 0x131   : > { %v1359_v58 = vpop.f32.mrf.mxu2  ;;  %v1378_v46 = vpop.f32.mrf.mxu3 }
 0x132   : > { %v1360_v42 = vadd.f32 %v1359_v58, %v1341_v54  ;;  %v1324_v47 = vpop.f32.mrf.mxu0  ;;  %v1343_v60 = vpop.f32.mrf.mxu1 }
 0x133   : > { %v1325_v48 = vadd.f32 %v1324_v47, %v472_v62 }
 0x134   : > { %v3902_v0 = vadd.f32 %v1378_v46, %v1360_v42  ;;  %v473_v42 = vperm.slane %v3804_v36, 3 }
 0x135   : > { %v1344_v1 = vadd.f32 %v1343_v60, %v1325_v48 }
 0x139   : > { %v1362_v2 = vpop.f32.mrf.mxu2  ;;  %v1381_v4 = vpop.f32.mrf.mxu3 }
 0x13a   : > { %v1363_v44 = vadd.f32 %v1362_v2, %v1344_v1  ;;  %v1326_v12 = vpop.f32.mrf.mxu0  ;;  %v1345_v20 = vpop.f32.mrf.mxu1 }
 0x13b   : > { %v1327_v16 = vadd.f32 %v1326_v12, %v472_v62 }
 0x13c   : > { %v3904_v27 = vadd.f32 %v1381_v4, %v1363_v44 }
 0x13d   : > { %v1346_v21 = vadd.f32 %v1345_v20, %v1327_v16 }
 0x13e   : > { %4033 = vst [vmem:[#allocation23_spill] sm:$0xff] %v3904_v27 }
 0x141   : > { %v1364_v24 = vpop.f32.mrf.mxu2  ;;  %v1383_v28 = vpop.f32.mrf.mxu3 }
 0x142   : > { %v1365_v51 = vadd.f32 %v1364_v24, %v1346_v21  ;;  %v1395_v54 = vpop.f32.mrf.mxu0  ;;  %v1414_v58 = vpop.f32.mrf.mxu1 }
 0x144   : > { %v3906_v13 = vadd.f32 %v1383_v28, %v1365_v51 }
 0x146   : > { %4034 = vst [vmem:[#allocation24_spill] sm:$0xff] %v3906_v13 }
 0x149   : > { %v1433_v46 = vpop.f32.mrf.mxu2  ;;  %v1452_v47 = vpop.f32.mrf.mxu3 }
 0x14a   : > { %v1397_v48 = vpop.f32.mrf.mxu0  ;;  %v1416_v1 = vpop.f32.mrf.mxu1 }
 0x14b   : > { %v1398_v60 = vadd.f32 %v1397_v48, %v473_v42 }
 0x14d   : > { %v1417_v2 = vadd.f32 %v1416_v1, %v1398_v60  ;;  %v1396_v60 = vadd.f32 %v1395_v54, %v473_v42 }
 0x151   : > { %v1435_v62 = vpop.f32.mrf.mxu2  ;;  %v1454_v44 = vpop.f32.mrf.mxu3 }
 0x152   : > { %v1436_v12 = vadd.f32 %v1435_v62, %v1417_v2  ;;  %v1400_v4 = vpop.f32.mrf.mxu0  ;;  %v1419_v20 = vpop.f32.mrf.mxu1 }
 0x153   : > { %v1401_v16 = vadd.f32 %v1400_v4, %v473_v42  ;;  %v1415_v4 = vadd.f32 %v1414_v58, %v1396_v60 }
 0x154   : > { %v3909_v21 = vadd.f32 %v1454_v44, %v1436_v12 }
 0x155   : > { %v1420_v24 = vadd.f32 %v1419_v20, %v1401_v16  ;;  %v1434_v20 = vadd.f32 %v1433_v46, %v1415_v4  ;;  %v1757_v4 = vstv %s1756_s30 }
 0x156   : > { %vm1758_vm0 = vcmp.eq.s32.totalorder %v1757_v4, 1 }
 0x159   : > { %v1438_v61 = vpop.f32.mrf.mxu2  ;;  %v1457_v28 = vpop.f32.mrf.mxu3 }
 0x15a   : > { %v1439_v51 = vadd.f32 %v1438_v61, %v1420_v24  ;;  %v1402_v13 = vpop.f32.mrf.mxu0  ;;  %v1421_v27 = vpop.f32.mrf.mxu1 }
 0x15b   : > { %v1403_v36 = vadd.f32 %v1402_v13, %v473_v42 }
 0x15c   : > { %v3911_v50 = vadd.f32 %v1457_v28, %v1439_v51 }
 0x15d   : > { %v1422_v48 = vadd.f32 %v1421_v27, %v1403_v36  ;;  %v1453_v27 = vadd.f32 %v1452_v47, %v1434_v20 }
 0x161   : > { %v1440_v1 = vpop.f32.mrf.mxu2  ;;  %v1459_v62 = vpop.f32.mrf.mxu3 }
 0x162   : > { %v1441_v2 = vadd.f32 %v1440_v1, %v1422_v48  ;;  %v1690_v32 = vpop.f32.mrf.mxu0  ;;  %v1703_v44 = vpop.f32.mrf.mxu1  ;;  %v1480_v1 = vld [vmem:[#allocation4] sm:$0xff] }
 0x163   : > { %v1733_v12 = vadd.f32 %v1690_v32, %v3827_v3  ;;  %v1734_v61 = vadd.f32 %v1703_v44, %v3871_v14 }
 0x164   : > { %v3914_v16 = vadd.f32 %v1459_v62, %v1441_v2 }
 0x165   : > { %v1737_v13 = vmul.f32 0.5, %v1733_v12  ;;  %v1738_v24 = vmul.f32 0.5, %v1734_v61 }
 0x167   : > { %3215 = vtanh.f32 %v1737_v13 }
 0x168   : > { %3217 = vtanh.f32 %v1738_v24 }
 0x169   : > { %v1716_v54 = vpop.f32.mrf.mxu2  ;;  %v1729_v58 = vpop.f32.mrf.mxu3 }
 0x16a   : > { %v1735_v42 = vadd.f32 %v1716_v54, %v3900_v31  ;;  %v1692_v51 = vpop.f32.mrf.mxu0  ;;  %v1736_v3 = vadd.f32 %v1729_v58, %v1453_v27  ;;  %v1705_v32 = vpop.f32.mrf.mxu1 }
 0x16b   : > { %v4037_v32 = vld [vmem:[#allocation21_spill] sm:$0xff] }
 0x16c   : > { %v1739_v28 = vmul.f32 0.5, %v1735_v42  ;;  %3219 = vtanh.f32 %v1736_v3 }
 0x16d   : > { %v3216_v36 = vpop.eup %3215 }
 0x16e   : > { %v3218_v14 = vpop.eup %3217  ;;  %v1743_v46 = vadd.f32 1.0, %v3216_v36  ;;  %3221 = vtanh.f32 %v1739_v28 }
 0x16f   : > { %v1744_v48 = vadd.f32 1.0, %v3218_v14 }
 0x170   : > { %v1746_v60 = vmul.f32 0.5, %v1743_v46 }
 0x171   : > { %v1747_v2 = vmul.f32 0.5, %v1744_v48  ;;  %v1718_v47 = vpop.f32.mrf.mxu2  ;;  %v1731_v62 = vpop.f32.mrf.mxu3 }
 0x172   : > { %v3220_v31 = vpop.eup %3219 }
 0x173   : > { %v1750_v12 = vmul.f32 %v1747_v2, %v1480_v1  ;;  %v1751_v44 = vmul.f32 %v3220_v31, %v1746_v60  ;;  %v4039_v60 = vld [vmem:[#allocation23_spill] sm:$0xff] }
 0x174   : > { %v3222_v61 = vpop.eup %3221 }
 0x175   : > { %v1752_v20 = vadd.f32 %v1751_v44, %v1750_v12  ;;  %v1745_v24 = vadd.f32 1.0, %v3222_v61 }
 0x177   : > { %3223 = vtanh.f32 %v1752_v20  ;;  %v3922_v13 = vsel %vm1758_vm0, %v1752_v20, %v1480_v1  ;;  %v1748_v27 = vmul.f32 0.5, %v1745_v24 }
 0x17d   : > { %v3224_v54 = vpop.eup %3223 }
 0x17e   : > { %v1754_v42 = vmul.f32 %v3224_v54, %v1748_v27  ;;  %v1935_v54 = vstv %s1934_s10 }
 0x17f   : > { %vm1936_vm2 = vcmp.eq.s32.totalorder %v1935_v54, 1 }
 0x180   : > { %v3925_v58 = vsel %vm1758_vm0, %v1754_v42, %v3809_v41 }
 0x181   : > { %v1768_v51 = vpack.c.bf16 %v3925_v58, %v3925_v58 }
 0x183   : > { %1777 = vmatmul.bf16.vlgmr.msrb.gmra.mxu0 %v1768_v51  ;;  %1790 = vmatmul.bf16.vlgmr.msrb.gmra.mxu1 %v1768_v51 }
 0x184   : > { %1803 = vmatmul.bf16.vlgmr.msrb.gmra.mxu2 %v1768_v51  ;;  %1816 = vmatmul.bf16.vlgmr.msrb.gmra.mxu3 %v1768_v51 }
 0x185   : > { %1947 = vmatpush.bf16.msrb.mxu0 %v3707_v5  ;;  %1960 = vmatpush.bf16.msrb.mxu1 %v3709_v6 }
 0x186   : > { %1973 = vmatpush.bf16.msrb.mxu2 %v3713_v8  ;;  %1986 = vmatpush.bf16.msrb.mxu3 %v3711_v7 }
 0x189   : > { %1948 = vmatpush.bf16.msrb.mxu0 %v3719_v17  ;;  %1961 = vmatpush.bf16.msrb.mxu1 %v3721_v18 }
 0x18a   : > { %1974 = vmatpush.bf16.msrb.mxu2 %v3726_v23  ;;  %1987 = vmatpush.bf16.msrb.mxu3 %v3723_v19 }
 0x18d   : > { %1949 = vmatpush.bf16.msrb.mxu0 %v3732_v29  ;;  %1962 = vmatpush.bf16.msrb.mxu1 %v3736_v49 }
 0x18e   : > { %1975 = vmatpush.bf16.msrb.mxu2 %v3741_v55  ;;  %1988 = vmatpush.bf16.msrb.mxu3 %v3738_v30 }
 0x191   : > { %1950 = vmatpush.bf16.msrb.mxu0 %v3744_v37  ;;  %1963 = vmatpush.bf16.msrb.mxu1 %v3748_v38 }
 0x192   : > { %1976 = vmatpush.bf16.msrb.mxu2 %v3753_v43  ;;  %1989 = vmatpush.bf16.msrb.mxu3 %v3750_v39 }
 0x195   : > { %1951 = vmatpush.bf16.msrb.mxu0 %v3756_v53  ;;  %1964 = vmatpush.bf16.msrb.mxu1 %v3760_v56 }
 0x196   : > { %1977 = vmatpush.bf16.msrb.mxu2 %v3765_v63  ;;  %1990 = vmatpush.bf16.msrb.mxu3 %v3762_v59 }
 0x199   : > { %1952 = vmatpush.bf16.msrb.mxu0 %v3768_v9  ;;  %1965 = vmatpush.bf16.msrb.mxu1 %v3772_v10  ;;  %v1846_v10 = vstv %s1845_s27 }
 0x19a   : > { %1978 = vmatpush.bf16.msrb.mxu2 %v3778_v15  ;;  %1991 = vmatpush.bf16.msrb.mxu3 %v3774_v11  ;;  %vm1847_vm1 = vcmp.eq.s32.totalorder %v1846_v10, 1 }
 0x19d   : > { %1953 = vmatpush.bf16.msrb.mxu0 %v3784_v25  ;;  %1966 = vmatpush.bf16.msrb.mxu1 %v3788_v45 }
 0x19e   : > { %1979 = vmatpush.bf16.msrb.mxu2 %v3793_v52  ;;  %1992 = vmatpush.bf16.msrb.mxu3 %v3790_v26 }
 0x1a1   : > { %1954 = vmatpush.bf16.msrb.mxu0 %v3796_v33  ;;  %1967 = vmatpush.bf16.msrb.mxu1 %v3800_v34 }
 0x1a2   : > { %1980 = vmatpush.bf16.msrb.mxu2 %v3807_v40  ;;  %1993 = vmatpush.bf16.msrb.mxu3 %v3802_v35 }
 0x200   : > { %v1778_v5 = vpop.f32.mrf.mxu0  ;;  %v1791_v6 = vpop.f32.mrf.mxu1 }
 0x201   : > { %v1821_v7 = vadd.f32 %v1778_v5, %v3837_v22  ;;  %v1822_v8 = vadd.f32 %v1791_v6, %v3881_v57 }
 0x203   : > { %v1825_v17 = vmul.f32 0.5, %v1821_v7  ;;  %v1826_v18 = vmul.f32 0.5, %v1822_v8 }
 0x205   : > { %3225 = vtanh.f32 %v1825_v17 }
 0x206   : > { %3227 = vtanh.f32 %v1826_v18 }
 0x207   : > { %v1804_v19 = vpop.f32.mrf.mxu2  ;;  %v1817_v23 = vpop.f32.mrf.mxu3 }
 0x208   : > { %v1823_v29 = vadd.f32 %v1804_v19, %v3902_v0  ;;  %v1824_v49 = vadd.f32 %v1817_v23, %v3909_v21  ;;  %v1780_v30 = vpop.f32.mrf.mxu0  ;;  %v1793_v55 = vpop.f32.mrf.mxu1  ;;  %v4036_v21 = vld [vmem:[#allocation19_spill] sm:$0xff] }
 0x209   : > { %v4040_v30 = vld [vmem:[#allocation20_spill] sm:$0xff] }
 0x20a   : > { %v1827_v37 = vmul.f32 0.5, %v1823_v29  ;;  %3229 = vtanh.f32 %v1824_v49 }
 0x20b   : > { %v3226_v38 = vpop.eup %3225 }
 0x20c   : > { %v3228_v39 = vpop.eup %3227  ;;  %v1831_v43 = vadd.f32 1.0, %v3226_v38  ;;  %3231 = vtanh.f32 %v1827_v37  ;;  %v4041_v37 = vld [vmem:[#allocation22_spill] sm:$0xff] }
 0x20d   : > { %v1832_v53 = vadd.f32 1.0, %v3228_v39 }
 0x20e   : > { %v1834_v56 = vmul.f32 0.5, %v1831_v43 }
 0x20f   : > { %v1835_v59 = vmul.f32 0.5, %v1832_v53  ;;  %v1806_v63 = vpop.f32.mrf.mxu2  ;;  %v1819_v9 = vpop.f32.mrf.mxu3 }
 0x210   : > { %v3230_v11 = vpop.eup %3229 }
 0x211   : > { %v1838_v15 = vmul.f32 %v1835_v59, %v3922_v13  ;;  %v1839_v25 = vmul.f32 %v3230_v11, %v1834_v56  ;;  %v4043_v59 = vld [vmem:[#allocation24_spill] sm:$0xff] }
 0x212   : > { %v3232_v45 = vpop.eup %3231 }
 0x213   : > { %v1840_v26 = vadd.f32 %v1839_v25, %v1838_v15  ;;  %v1833_v33 = vadd.f32 1.0, %v3232_v45 }
 0x215   : > { %3233 = vtanh.f32 %v1840_v26  ;;  %v1849_v52 = vsel %vm1847_vm1, %v1840_v26, %v3922_v13  ;;  %v1836_v34 = vmul.f32 0.5, %v1833_v33 }
 0x21b   : > { %v3234_v35 = vpop.eup %3233 }
 0x21c   : > { %v1842_v40 = vmul.f32 %v3234_v35, %v1836_v34  ;;  %v2024_v35 = vstv %s2023_s24 }
 0x21d   : > { %vm2025_vm3 = vcmp.eq.s32.totalorder %v2024_v35, 1 }
 0x21e   : > { %v1848_v41 = vsel %vm1847_vm1, %v1842_v40, %v3925_v58 }
 0x21f   : > { %v1857_v22 = vpack.c.bf16 %v1848_v41, %v1848_v41 }
 0x221   : > { %1866 = vmatmul.bf16.vlgmr.msra.gmra.mxu0 %v1857_v22  ;;  %1879 = vmatmul.bf16.vlgmr.msra.gmra.mxu1 %v1857_v22 }
 0x222   : > { %1892 = vmatmul.bf16.vlgmr.msra.gmra.mxu2 %v1857_v22  ;;  %1905 = vmatmul.bf16.vlgmr.msra.gmra.mxu3 %v1857_v22 }
 0x29e   : > { %v1867_v57 = vpop.f32.mrf.mxu0  ;;  %v1880_v0 = vpop.f32.mrf.mxu1 }
 0x29f   : > { %v1910_v3 = vadd.f32 %v1867_v57, %v4036_v21  ;;  %v1911_v28 = vadd.f32 %v1880_v0, %v4037_v32 }
 0x2a1   : > { %v1914_v36 = vmul.f32 0.5, %v1910_v3  ;;  %v1915_v14 = vmul.f32 0.5, %v1911_v28 }
 0x2a3   : > { %3235 = vtanh.f32 %v1914_v36 }
 0x2a4   : > { %3237 = vtanh.f32 %v1915_v14 }
 0x2a5   : > { %v1893_v46 = vpop.f32.mrf.mxu2  ;;  %v1906_v48 = vpop.f32.mrf.mxu3 }
 0x2a6   : > { %v1912_v1 = vadd.f32 %v1893_v46, %v4039_v60  ;;  %v1913_v2 = vadd.f32 %v1906_v48, %v3911_v50  ;;  %v1869_v47 = vpop.f32.mrf.mxu0  ;;  %v1882_v62 = vpop.f32.mrf.mxu1 }
 0x2a8   : > { %v1916_v4 = vmul.f32 0.5, %v1912_v1  ;;  %3239 = vtanh.f32 %v1913_v2 }
 0x2a9   : > { %v3236_v31 = vpop.eup %3235 }
 0x2aa   : > { %v3238_v12 = vpop.eup %3237  ;;  %v1920_v44 = vadd.f32 1.0, %v3236_v31  ;;  %3241 = vtanh.f32 %v1916_v4 }
 0x2ab   : > { %v1921_v61 = vadd.f32 1.0, %v3238_v12 }
 0x2ac   : > { %v1923_v20 = vmul.f32 0.5, %v1920_v44 }
 0x2ad   : > { %v1924_v13 = vmul.f32 0.5, %v1921_v61  ;;  %v1895_v24 = vpop.f32.mrf.mxu2  ;;  %v1908_v27 = vpop.f32.mrf.mxu3 }
 0x2ae   : > { %v3240_v42 = vpop.eup %3239 }
 0x2af   : > { %v1927_v58 = vmul.f32 %v1924_v13, %v1849_v52  ;;  %v1928_v51 = vmul.f32 %v3240_v42, %v1923_v20 }
 0x2b0   : > { %v3242_v50 = vpop.eup %3241 }
 0x2b1   : > { %v1929_v5 = vadd.f32 %v1928_v51, %v1927_v58  ;;  %v1922_v7 = vadd.f32 1.0, %v3242_v50 }
 0x2b3   : > { %3243 = vtanh.f32 %v1929_v5  ;;  %v1938_v6 = vsel %vm1936_vm2, %v1929_v5, %v1849_v52  ;;  %v1925_v8 = vmul.f32 0.5, %v1922_v7 }
 0x2b9   : > { %v3244_v17 = vpop.eup %3243 }
 0x2ba   : > { %v1931_v18 = vmul.f32 %v3244_v17, %v1925_v8 }
 0x2bc   : > { %v1937_v19 = vsel %vm1936_vm2, %v1931_v18, %v1848_v41 }
 0x2bd   : > { %v1946_v23 = vpack.c.bf16 %v1937_v19, %v1937_v19 }
 0x2bf   : > { %1955 = vmatmul.bf16.vlgmr.msrb.gmra.mxu0 %v1946_v23  ;;  %1968 = vmatmul.bf16.vlgmr.msrb.gmra.mxu1 %v1946_v23 }
 0x2c0   : > { %1981 = vmatmul.bf16.vlgmr.msrb.gmra.mxu2 %v1946_v23  ;;  %1994 = vmatmul.bf16.vlgmr.msrb.gmra.mxu3 %v1946_v23 }
 0x33c   : > { %v1956_v29 = vpop.f32.mrf.mxu0  ;;  %v1969_v49 = vpop.f32.mrf.mxu1 }
 0x33d   : > { %v1999_v55 = vadd.f32 %v1956_v29, %v4040_v30  ;;  %v2000_v38 = vadd.f32 %v1969_v49, %v4041_v37 }
 0x33f   : > { %v2003_v39 = vmul.f32 0.5, %v1999_v55  ;;  %v2004_v43 = vmul.f32 0.5, %v2000_v38 }
 0x341   : > { %3245 = vtanh.f32 %v2003_v39 }
 0x342   : > { %3247 = vtanh.f32 %v2004_v43 }
 0x343   : > { %v1982_v53 = vpop.f32.mrf.mxu2  ;;  %v1995_v56 = vpop.f32.mrf.mxu3 }
 0x344   : > { %v2001_v63 = vadd.f32 %v1982_v53, %v4043_v59  ;;  %v2002_v9 = vadd.f32 %v1995_v56, %v3914_v16  ;;  %v1958_v10 = vpop.f32.mrf.mxu0  ;;  %v1971_v11 = vpop.f32.mrf.mxu1 }
 0x346   : > { %v2005_v15 = vmul.f32 0.5, %v2001_v63  ;;  %3249 = vtanh.f32 %v2002_v9 }
 0x347   : > { %v3246_v25 = vpop.eup %3245 }
 0x348   : > { %v3248_v45 = vpop.eup %3247  ;;  %v2009_v26 = vadd.f32 1.0, %v3246_v25  ;;  %3251 = vtanh.f32 %v2005_v15 }
 0x349   : > { %v2010_v52 = vadd.f32 1.0, %v3248_v45 }
 0x34a   : > { %v2012_v33 = vmul.f32 0.5, %v2009_v26 }
 0x34b   : > { %v2013_v34 = vmul.f32 0.5, %v2010_v52  ;;  %v1984_v40 = vpop.f32.mrf.mxu2  ;;  %v1997_v41 = vpop.f32.mrf.mxu3 }
 0x34c   : > { %v3250_v22 = vpop.eup %3249 }
 0x34d   : > { %v2016_v57 = vmul.f32 %v2013_v34, %v1938_v6  ;;  %v2017_v0 = vmul.f32 %v3250_v22, %v2012_v33 }
 0x34e   : > { %v3252_v16 = vpop.eup %3251 }
 0x34f   : > { %v2018_v21 = vadd.f32 %v2017_v0, %v2016_v57  ;;  %v2011_v32 = vadd.f32 1.0, %v3252_v16 }
 0x351   : > { %3253 = vtanh.f32 %v2018_v21  ;;  %v2027_v3 = vsel %vm2025_vm3, %v2018_v21, %v1938_v6  ;;  %v2014_v28 = vmul.f32 0.5, %v2011_v32 }
 0x352   : > { %2029 = vst [vmem:[#allocation4] sm:$0xff] %v2027_v3 }
 0x357   : > { %v3254_v36 = vpop.eup %3253  ;;  %2033 = sbr.rel (%p2908_p13) target bundleno = 1026 (0x402), region = 72 }
 0x358   : > { %v2020_v14 = vmul.f32 %v3254_v36, %v2014_v28 }
 0x35a   : > { %v2026_v46 = vsel %vm2025_vm3, %v2020_v14, %v1937_v19 }
 0x35b   : > { %2028 = vst [vmem:[#allocation3] sm:$0xff] %v2026_v46 }
 0x35c   : > { %v3122_v48 = vld [vmem:[#allocation13 + $0x38] sm:$0xff]  ;;  %v3121_v60 = vld [vmem:[#allocation13 + $0x30] sm:$0xff]  ;;  %v3120_v1 = vld [vmem:[#allocation13 + $0x28] sm:$0xff]  ;;  %v2034_v12 = vpack.c.bf16 %v2026_v46, %v2026_v46 }
 0x35d   : > { %2103 = vmatpush.bf16.msra.mxu0 %v3122_v48  ;;  %v3119_v2 = vld [vmem:[#allocation13 + $0x20] sm:$0xff]  ;;  %v3118_v47 = vld [vmem:[#allocation13 + $0x18] sm:$0xff]  ;;  %v3117_v62 = vld [vmem:[#allocation13 + $0x10] sm:$0xff] }
 0x35e   : > { %v3116_v4 = vld [vmem:[#allocation13 + $0x8] sm:$0xff]  ;;  %v3115_v31 = vld [vmem:[#allocation13] sm:$0xff] }
 0x35f   : > { %v3255_v44 = vld [vmem:[%s4023_s5] ss:$0 sm:$0xff] }
 0x361   : > { %2104 = vmatpush.bf16.msra.mxu0 %v3121_v60 }
 0x365   : > { %2105 = vmatpush.bf16.msra.mxu0 %v3120_v1 }
 0x369   : > { %2106 = vmatpush.bf16.msra.mxu0 %v3119_v2 }
 0x36d   : > { %2107 = vmatpush.bf16.msra.mxu0 %v3118_v47 }
 0x371   : > { %2108 = vmatpush.bf16.msra.mxu0 %v3117_v62 }
 0x375   : > { %2109 = vmatpush.bf16.msra.mxu0 %v3116_v4 }
 0x379   : > { %2110 = vmatpush.bf16.msra.mxu0 %v3115_v31 }
 0x37c   : > { %2111 = vmatmul.bf16.vlgmr.msra.gmra.mxu0 %v2034_v12 }
 0x3f9   : > { %v2112_v61 = vpop.f32.mrf.mxu0 }
 0x3fa   : > { %v2113_v20 = vadd.f32 %v3255_v44, %v2112_v61 }
 0x3fc   : > { %2116 = vst [vmem:[#allocation14] sm:$0xff] %v2113_v20 }
 0x401   : > { %v2114_v13 = vpop.f32.mrf.mxu0 }
 0x402 PF: > { %p3171_p0 = scmp.eq.s32.totalorder %s3546_s25, 1  ;;  %s3491_s20 = smov [#allocation14]  }
 0x403   : > { %s2123_s21 = sshll.u32 %s3491_s20, 4  ;;  %s2125_s9 = sshll.u32 %s4024_s6, 4  ;;  %s2124_s21 = int_to_ptr.vmem [resolvable:$true] %s2123_s21  ;;  %s2126_s9 = int_to_ptr.hbm [resolvable:$true] %s2125_s9 }
 0x404   : > { %3142 = dma.vmem_to_hbm [thread:$0]  (%p3171_p0), %s2124_s21, 128, %s2126_s9, [#allocation7]  }
 0x405   : > { %3463 = dma.done.wait (%p3171_p0), [#allocation7], 128  }
 0x406   : > { %3465 = vsyncadd (%p3171_p0), [#allocation7], 4294967168 }
 0x407 PF: > { %p19_p2 = scmp.ge.s32.totalorder %s3598_s12, 4   ;;  %s4044_s21 = smov %s3472_s22 }
 0x408   : > { %s4045_s22 = smov %s3476_s23  ;;  %s4046_s23 = smov %s3607_s17 }
 0x409   : > { %s4047_s24 = smov %s3598_s12  ;;  %21 = sbr.rel (!%p19_p2) target bundleno = 6 (0x6), region = 109 }
 0x40e   :  { %2139 = vsyncpa [#allocation6], 1 }
 0x40f   :  { %2141 = vsyncpa [#allocation6 + $0x1], 1 }
 0x410   :  { %2142 = vsyncpa [#allocation9], 1 }
 0x411   :  { %2143 = vsyncpa [#allocation12], 1 }
 0x412   :  { %2144 = vsyncpa [#allocation7], 1 }
 0x413   :  { %2146 = vsyncpa [#allocation7 + $0x1], 1 }

</bundles_post_ra>
